<compile_context>
chip_gen: v5e
topology: v5e:2x2
jax: 0.10.0
libtpu: 0.0.40
codegen_flags: <defaults>
</compile_context>

<pallas_src>
import functools

import jax
import jax.numpy as jnp
from jax import lax
from jax.experimental import pallas as pl
from jax.experimental.pallas import tpu as pltpu


# ----------------------------- kernel ------------------------------------- #

def _spd_transform_kernel(x_ref, w_ref, wt_ref, o_ref, *, precision):
    # x_ref : (tb, N, N) input block
    # w_ref : (N, M) weight       (resident across grid steps)
    # wt_ref: (M, N) weight^T     (resident; no in-kernel transpose needed)
    # o_ref : (tb, M, M) output block
    w = w_ref[...]
    wt = wt_ref[...]
    tb, n, _ = x_ref.shape
    m = w.shape[-1]

    x = x_ref[...]
    if n % 8 == 0:
        # Stage 1: Y = X @ W as ONE flat MXU matmul.
        # (tb, N, N) -> (tb*N, N) merges leading dims only (layout-preserving
        # since N is a multiple of the 8-row sublane tile).
        y = lax.dot_general(
            x.reshape(tb * n, n), w, (((1,), (0,)), ((), ())),
            precision=precision, preferred_element_type=jnp.float32,
        ).reshape(tb, n, m)
    else:
        # Fallback for non-sublane-aligned N: batched matmul (standard
        # 'bqk,bkd->bqd' pattern) — still no Python-level unroll over tb.
        w_b = jnp.broadcast_to(w, (tb, n, m))
        y = jnp.einsum("bnk,bkm->bnm", x, w_b,
                       precision=precision,
                       preferred_element_type=jnp.float32)

    # Stage 2: out[b] = W^T @ Y[b] as a single batched matmul.
    wt_b = jnp.broadcast_to(wt, (tb, m, n))          # hoisted once per step
    out = jnp.einsum("bin,bnj->bij", wt_b, y,
                     precision=precision,
                     preferred_element_type=jnp.float32)
    o_ref[...] = out.astype(o_ref.dtype)


# --------------------------- block sizing ---------------------------------- #

def _round_up(v, mult):
    return -(-v // mult) * mult


def _padded_mat_bytes(rows, cols, itemsize):
    """VMEM bytes of one (rows, cols) tile under the (8, 128) layout."""
    return _round_up(rows, 8) * _round_up(cols, 128) * itemsize


def _vmem_footprint(tb, n, m, itemsize):
    """Conservative padded-VMEM footprint of one grid step."""
    in_blk = tb * _padded_mat_bytes(n, n, itemsize)
    out_blk = tb * _padded_mat_bytes(m, m, itemsize)
    # y, broadcast W^T, f32 out temp, possible x materialization.
    temps = tb * (_padded_mat_bytes(n, m, 4) + _padded_mat_bytes(m, n, 4)
                  + _padded_mat_bytes(m, m, 4) + _padded_mat_bytes(n, n, itemsize))
    weights = 2 * (_padded_mat_bytes(n, m, itemsize)
                   + _padded_mat_bytes(m, n, itemsize))
    # 2x for input/output double-buffering.
    return 2 * in_blk + 2 * out_blk + temps + weights


def _pick_tb(batch, n, m, itemsize, *, target_block_bytes=4 << 20,
             max_total_bytes=40 << 20, min_grid=4):
    """Largest divisor of `batch` whose PADDED footprint fits the budget and
    which leaves at least `min_grid` grid steps (DMA overlap / megacore)."""
    per_mat = _padded_mat_bytes(n, n, itemsize)
    cap = max(1, target_block_bytes // per_mat)
    if batch >= min_grid:
        cap = min(cap, max(1, batch // min_grid))
    best = 1
    for d in range(1, batch + 1):
        if (batch % d == 0 and d <= cap
                and _vmem_footprint(d, n, m, itemsize) <= max_total_bytes):
            best = d
    return best


# ----------------------------- wrapper ------------------------------------- #

def spd_transform(x, weight, *, tb=None, precision=lax.Precision.HIGHEST):
    """out[b] = weight^T @ x[b] @ weight.

    x: (B, N, N), weight: (N, M) -> (B, M, M).
    Implements the module's default in_channels=1 path (2-D weight).
    """
    B, N, N2 = x.shape
    assert N == N2, "expected square matrices"
    Nw, M = weight.shape
    assert Nw == N, "weight rows must match matrix size"

    itemsize = x.dtype.itemsize
    if tb is None:
        tb = _pick_tb(B, N, M, itemsize)
    assert B % tb == 0, "batch must be divisible by the block size tb"
    # TODO(synk): prime/awkward B degrades to tb=1; a pl.cdiv grid with a
    # masked last block would avoid that.

    vmem_bytes = int(min(48 << 20,
                         max(16 << 20,
                             _vmem_footprint(tb, N, M, itemsize) + (8 << 20))))

    wt = weight.T  # transposed once in plain JAX; resident operand in-kernel

    kernel = functools.partial(_spd_transform_kernel, precision=precision)
    return pl.pallas_call(
        kernel,
        out_shape=jax.ShapeDtypeStruct((B, M, M), x.dtype),
        grid_spec=pltpu.PrefetchScalarGridSpec(
            num_scalar_prefetch=0,
            grid=(B // tb,),
            in_specs=[
                pl.BlockSpec((tb, N, N), lambda i: (i, 0, 0)),   # x block
                pl.BlockSpec((N, M), lambda i: (0, 0)),          # W (resident)
                pl.BlockSpec((M, N), lambda i: (0, 0)),          # W^T (resident)
            ],
            out_specs=pl.BlockSpec((tb, M, M), lambda i: (i, 0, 0)),
        ),
        compiler_params=pltpu.CompilerParams(
            dimension_semantics=("parallel",),
            vmem_limit_bytes=vmem_bytes),
    )(x, weight, wt)


# ----------------------------- reference ----------------------------------- #

def _reference(x, weight):
    wt_x = jnp.einsum("nm,bnk->bmk", weight, x,
                      precision=lax.Precision.HIGHEST)
    return jnp.einsum("bmn,nk->bmk", wt_x, weight,
                      precision=lax.Precision.HIGHEST)


if __name__ == "__main__":
    key = jax.random.PRNGKey(0)
    k_x, k_w = jax.random.split(key)

    B, N, M = 32, 32, 16       # batch, input_size, output_size (in_channels=1)

    # Batch of SPD matrices (the module's domain).
    a = jax.random.normal(k_x, (B, N, N), dtype=jnp.float32)
    x = a @ jnp.swapaxes(a, -1, -2) + 1e-3 * jnp.eye(N, dtype=jnp.float32)

    # StiefelParameter + nn.init.orthogonal_: orthonormal columns via QR.
    # TODO(synk): parameter construction/init has no in-kernel equivalent; plain JAX.
    q, _ = jnp.linalg.qr(jax.random.normal(k_w, (N, N), dtype=jnp.float32))
    weight = q[:, :M].astype(jnp.float32)

    out = jax.block_until_ready(spd_transform(x, weight))   # grid = (4,), tb = 8

    ref = _reference(x, weight)
    assert out.shape == (B, M, M) and out.dtype == x.dtype
    assert jnp.allclose(out, ref, atol=1e-3, rtol=1e-3), "mismatch vs reference"

    print("KERNEL_OK")
</pallas_src>

<mosaic_0001>
module attributes {stable_mosaic.version = 11 : i64} {
  func.func @_spd_transform_kernel(%arg0: i32, %arg1: memref<8x32x32xf32, #tpu.memory_space<vmem>>, %arg2: memref<32x16xf32, #tpu.memory_space<vmem>>, %arg3: memref<16x32xf32, #tpu.memory_space<vmem>>, %arg4: memref<8x16x16xf32, #tpu.memory_space<vmem>>) attributes {dimension_semantics = [#tpu.dimension_semantics<parallel>], iteration_bounds = array<i64: 4>, scalar_prefetch = 0 : i64, scratch_operands = 0 : i64, tpu.core_type = #tpu.core_type<tc>, window_params = [{transform_indices = @transform_0, window_bounds = array<i64: 8, 32, 32>}, {pipeline_mode = #tpu.pipeline_mode<synchronous>, transform_indices = @transform_1, window_bounds = array<i64: 32, 16>}, {pipeline_mode = #tpu.pipeline_mode<synchronous>, transform_indices = @transform_2, window_bounds = array<i64: 16, 32>}, {transform_indices = @transform_3, window_bounds = array<i64: 8, 16, 16>}]} {
    %c0 = arith.constant 0 : index
    %c0_0 = arith.constant 0 : index
    %0 = vector.load %arg2[%c0, %c0_0] : memref<32x16xf32, #tpu.memory_space<vmem>>, vector<32x16xf32>
    %c0_1 = arith.constant 0 : index
    %c0_2 = arith.constant 0 : index
    %1 = vector.load %arg3[%c0_1, %c0_2] : memref<16x32xf32, #tpu.memory_space<vmem>>, vector<16x32xf32>
    %c0_3 = arith.constant 0 : index
    %c0_4 = arith.constant 0 : index
    %c0_5 = arith.constant 0 : index
    %2 = vector.load %arg1[%c0_3, %c0_4, %c0_5] : memref<8x32x32xf32, #tpu.memory_space<vmem>>, vector<8x32x32xf32>
    %3 = vector.shape_cast %2 : vector<8x32x32xf32> to vector<256x32xf32>
    %cst = arith.constant dense<0.000000e+00> : vector<256x16xf32>
    %4 = tpu.matmul %3, %0, %cst {dimension_numbers = #tpu.dot_dimension_numbers<[1], [0], [0], [1], [0, 0, 1, 1], [], []>, precision = #tpu.contract_precision<fp32>} : vector<256x32xf32>, vector<32x16xf32>, vector<256x16xf32> -> vector<256x16xf32>
    %5 = vector.shape_cast %4 : vector<256x16xf32> to vector<8x32x16xf32>
    %6 = vector.shape_cast %1 : vector<16x32xf32> to vector<1x16x32xf32>
    %7 = vector.broadcast %6 : vector<1x16x32xf32> to vector<8x16x32xf32>
    "tpu.trace_start"() <{level = 10 : i32, message = "bin,bnj->bij"}> : () -> ()
    %cst_6 = arith.constant dense<0.000000e+00> : vector<8x16x16xf32>
    %8 = tpu.matmul %7, %5, %cst_6 {dimension_numbers = #tpu.dot_dimension_numbers<[2], [1], [1], [2], [0, 0, 0, 1, 1, 2], [0], [0]>, precision = #tpu.contract_precision<fp32>} : vector<8x16x32xf32>, vector<8x32x16xf32>, vector<8x16x16xf32> -> vector<8x16x16xf32>
    "tpu.trace_stop"() : () -> ()
    %c0_7 = arith.constant 0 : index
    %c0_8 = arith.constant 0 : index
    %c0_9 = arith.constant 0 : index
    %9 = vector.load %arg4[%c0_7, %c0_8, %c0_9] : memref<8x16x16xf32, #tpu.memory_space<vmem>>, vector<8x16x16xf32>
    tpu.vector_store %arg4[%c0_7, %c0_8, %c0_9], %8 {strides = array<i32>} : memref<8x16x16xf32, #tpu.memory_space<vmem>>, vector<8x16x16xf32>,
    return
  }
  func.func @transform_0(%arg0: i32) -> (i32, i32, i32) {
    %c0_i32 = arith.constant 0 : i32
    %c0_i32_0 = arith.constant 0 : i32
    %c0_i32_1 = arith.constant 0 : i32
    return %arg0, %c0_i32, %c0_i32_0 : i32, i32, i32
  }
  func.func @transform_1(%arg0: i32) -> (i32, i32) {
    %c0_i32 = arith.constant 0 : i32
    %c0_i32_0 = arith.constant 0 : i32
    %c0_i32_1 = arith.constant 0 : i32
    return %c0_i32, %c0_i32_0 : i32, i32
  }
  func.func @transform_2(%arg0: i32) -> (i32, i32) {
    %c0_i32 = arith.constant 0 : i32
    %c0_i32_0 = arith.constant 0 : i32
    %c0_i32_1 = arith.constant 0 : i32
    return %c0_i32, %c0_i32_0 : i32, i32
  }
  func.func @transform_3(%arg0: i32) -> (i32, i32, i32) {
    %c0_i32 = arith.constant 0 : i32
    %c0_i32_0 = arith.constant 0 : i32
    %c0_i32_1 = arith.constant 0 : i32
    return %arg0, %c0_i32, %c0_i32_0 : i32, i32, i32
  }
}

</mosaic_0001>

<bundles_post_ra>
// kernel: tpu_custom_call.1
= control target key start
LH: loop header
LB: loop body
LE: loop exit
PB: predicated region body
PF: predicated region fallthrough
CT: control target
= control target key end

     0   :  { %8 = vsyncpa [#allocation3], 0  ;;  %s4809_s0 = inlined_call_operand.hbm [shape: f32[32,32,32], index: 0, kind: input, shape index: {}]   ;;  %s4810_s1 = inlined_call_operand.vmem [shape: f32[32,16], index: 1, kind: input, shape index: {}]   ;;  %s4811_s2 = inlined_call_operand.vmem [shape: f32[16,32], index: 2, kind: input, shape index: {}]   ;;  %s4812_s3 = inlined_call_operand.vmem [shape: f32[32,16,16], index: 3, kind: output, shape index: {}]  }
   0x1   :  { %10 = vsyncpa [#allocation3 + $0x1], 0  ;;  %s3446_s12 = smov 0   ;;  %s3448_s13 = smov 0  }
   0x2   :  { %s3450_s14 = smov 0   ;;  %s3452_s15 = smov 0  }
   0x3 LB: > { %s3299_s16 = sadd.s32 4294967295, %s3422_s15   ;;  %s3466_s17 = sadd.s32 1, %s3422_s15   ;;  %s3422_s15 = sphi %s3452_s15, %s4961_s15   ;;  %s3418_s14 = sphi %s3450_s14, %s4960_s14   ;;  %s3414_s13 = sphi %s3448_s13, %s4959_s13   ;;  %s3410_s12 = sphi %s3446_s12, %s4958_s12  }
   0x4   : > { %s20_s18 = ssub.s32 %s3422_s15, %s3466_s17  ;;  %s23_s19 = sadd.s32 1, %s3418_s14 }
   0x5   : > { %p21_p0 = scmp.eq.s32.totalorder %s20_s18, 0  ;;  %p30_p1 = scmp.ne.s32.totalorder %s3418_s14, %s3414_s13 }
   0x6   : > { %p31_p2 = scmp.eq.s32.totalorder %s3422_s15, 0  ;;  %p36_p3 = scmp.ne.s32.totalorder %s3414_s13, %s3410_s12 }
   0x7   : > { %s3476_s20 = scalar_select %p21_p0, %s3418_s14, %s23_s19  }
   0x8   : > { %p3478_p4 = por %p31_p2, %p30_p1  ;;  %p37_p5 = scmp.eq.s32.totalorder %s3299_s16, 0 }
   0x9   : > { %p3323_p6 = scmp.lt.s32.totalorder %s3422_s15, 4  ;;  %s134_s23 = sand.u32 1, %s3418_s14  }
   0xa   : > { %p3485_p7 = por %p37_p5, %p36_p3  ;;  %s3303_s24 = sshll.u32 %s134_s23, 8 }
   0xb   : > { %s3315_s25 = sshll.u32 %s3422_s15, 8  ;;  %s138_s29 = scalar_lea.vmem [#allocation2], %s3303_s24 }
   0xc   : > { %s144_s28 = scalar_lea.hbm %s4809_s0, %s3315_s25  ;;  %s147_s30 = sshll.u32 %s138_s29, 4  ;;  %s148_s30 = int_to_ptr.vmem [resolvable:$true] %s147_s30 }
   0xd   : > { %s145_s4 = sshll.u32 %s144_s28, 4  ;;  %p3496_p8 = pnand %p3323_p6, %p3478_p4  ;;  %s146_s4 = int_to_ptr.hbm [resolvable:$true] %s145_s4 }
   0xe   : > { %p3307_p9 = scmp.ge.s32.totalorder %s3422_s15, 1  ;;  %s135_s6 = scalar_lea.sflag [#allocation3], %s134_s23 }
   0xf   : > { %s3358_s7 = sshra.s32 %s146_s4, 4  ;;  %p3362_p11 = pneg %p3496_p8  ;;  %s3359_s7 = int_to_ptr.hbm [resolvable:$true] %s3358_s7 }
  0x10   : > { %s3360_s8 = scalar_lea.hbm %s3359_s7, 256  ;;  %s3365_s11 = scalar_lea.hbm %s4809_s0, 1024 }
  0x11   : > { %p3361_p10 = scmp.ne.s32.totalorder %s3359_s7, %s3360_s8  ;;  %p3366_p0 = scmp.lt.s32.totalorder %s3359_s7, %s4809_s0 }
  0x12   : > { %p3367_p1 = scmp.lt.s32.totalorder %s3365_s11, %s3360_s8 }
  0x13   : > { %p3363_p12 = pnand %p3362_p11, %p3361_p10 }
  0x14   : > { %p3368_p2 = por %p3367_p1, %p3366_p0 }
  0x15   : > { %p3364_p13 = pneg %p3363_p12 }
  0x17   : > { %p3369_p3 = pnand %p3368_p2, %p3364_p13 }
  0x19   : > { %3372 = shalt.err (!%p3369_p3)
}
  0x1a   : > { %s3424_s19 = smov 128   ;;  %s3425_s21 = smov 8  }
  0x1b   : > { %3322 = dma.hbm_to_vmem [thread:$0]  (!%p3496_p8), %s146_s4, 4096, %s148_s30, %s135_s6, %s3424_s19, %s3424_s19, %s3425_s21  }
  0x1c   : > { %p155_p4 = scmp.lt.s32.totalorder %s3422_s15, 5 }
  0x1e   : > { %p156_p5 = pnand %p3307_p9, %p155_p4 }
  0x20   : > { %159 = sbr.rel (%p156_p5) target bundleno = 934 (0x3a6), region = 32 }
  0x25   : > { %s161_s23 = sand.u32 1, %s3414_s13  }
  0x26   : > { %s3308_s24 = sshll.u32 %s161_s23, 8  ;;  %s162_s25 = scalar_lea.sflag [#allocation3], %s161_s23 }
  0x27   : > { %s3515_s26 = scalar_lea.vmem [#allocation2], %s3308_s24 }
  0x28   : > { %3405 = dma.done.wait (%p3485_p7), %s162_s25, 4096  }
  0x29   : > { %3407 = vsyncadd (%p3485_p7), %s162_s25, 4294963200  ;;  %vm236_vm0 = vcmask 261120   ;;  %v201_v0 = vld [vmem:[%s4810_s1 + $0x18] sm:$0xff]  ;;  %v200_v1 = vld [vmem:[%s4810_s1 + $0x10] sm:$0xff]  ;;  %s3309_s11 = sshll.u32 %s3299_s16, 3  ;;  %vm3213_vm1 = vcmask 130048  }
  0x2a   : > { %v199_v2 = vld [vmem:[%s4810_s1 + $0x8] sm:$0xff]  ;;  %v3530_v3 = vand.u32 4294901760, %v201_v0  ;;  %v3532_v4 = vand.u32 4294901760, %v200_v1  ;;  %v198_v6 = vld [vmem:[%s4810_s1] sm:$0xff]  ;;  %v206_v12 = vld [vmem:[%s3515_s26 + $0x10] sm:$0xff]  ;;  %p192_p6 = scmp.lt.s32.totalorder %s3309_s11, 31 }
  0x2b   : > { %v3534_v5 = vand.u32 4294901760, %v199_v2  ;;  %v204_v7 = vld [vmem:[%s3515_s26] sm:$0xff]  ;;  %v205_v8 = vld [vmem:[%s3515_s26 + $0x8] sm:$0xff]  ;;  %v3541_v9 = vand.u32 4294901760, %v198_v6  ;;  %v244_v19 = vsel %vm236_vm0, %v206_v12, 0  ;;  %v207_v38 = vld [vmem:[%s3515_s26 + $0x18] sm:$0xff] }
  0x2c   : > { %v238_v10 = vsel %vm236_vm0, %v204_v7, 0  ;;  %v241_v11 = vsel %vm236_vm0, %v205_v8, 0  ;;  %346 = vmatpush.msra.mxu0 %v3530_v3  ;;  %v623_v13 = vsub.f32 %v201_v0, %v3530_v3  ;;  %v629_v14 = vsub.f32 %v200_v1, %v3532_v4  ;;  %973 = vmatpush.msra.mxu3 %v3530_v3  ;;  %v208_v46 = vld [vmem:[%s3515_s26 + $0x20] sm:$0xff]  ;;  %v209_v53 = vld [vmem:[%s3515_s26 + $0x28] sm:$0xff]  ;;  %v210_v60 = vld [vmem:[%s3515_s26 + $0x30] sm:$0xff]  ;;  %s4963_s11 = smov (!%p192_p6, %s3309_s11), 31 }
  0x2d   : > { %v635_v15 = vsub.f32 %v199_v2, %v3534_v5  ;;  %v3551_v16 = vand.u32 4294901760, %v238_v10  ;;  %v641_v17 = vsub.f32 %v198_v6, %v3541_v9  ;;  %v3554_v18 = vand.u32 4294901760, %v241_v11  ;;  %s3316_s15 = sshll.u32 %s4963_s11, 4 }
  0x2e   : > { %348 = vmatpush.msra.mxu0 %v3532_v4  ;;  %789 = vmatpush.msra.mxu2 %v623_v13  ;;  %v624_v20 = vand.u32 4294901760, %v623_v13  ;;  %v630_v22 = vand.u32 4294901760, %v629_v14  ;;  %v3563_v31 = vand.u32 4294901760, %v244_v19  ;;  %v247_v42 = vsel %vm236_vm0, %v207_v38, 0  ;;  %s4535_s18 = scalar_lea.vmem %s4812_s3, %s3316_s15 }
  0x2f   : > { %v354_v21 = vsub.f32 %v238_v10, %v3551_v16  ;;  %v636_v23 = vand.u32 4294901760, %v635_v15  ;;  %975 = vmatpush.msra.mxu3 %v3532_v4  ;;  %v642_v24 = vand.u32 4294901760, %v641_v17  ;;  %v362_v25 = vsub.f32 %v241_v11, %v3554_v18  ;;  %v212_v10 = vld [vmem:[%s3515_s26 + $0x40] sm:$0xff] }
  0x30   : > { %350 = vmatpush.msra.mxu0 %v3534_v5  ;;  %792 = vmatpush.msra.mxu2 %v629_v14  ;;  %v625_v26 = vsub.f32 %v623_v13, %v624_v20  ;;  %v631_v28 = vsub.f32 %v629_v14, %v630_v22  ;;  %v370_v41 = vsub.f32 %v244_v19, %v3563_v31  ;;  %v3570_v45 = vand.u32 4294901760, %v247_v42  ;;  %v213_v19 = vld [vmem:[%s3515_s26 + $0x48] sm:$0xff] }
  0x31   : > { %v355_v27 = vand.u32 4294901760, %v354_v21  ;;  %v637_v29 = vsub.f32 %v635_v15, %v636_v23  ;;  %977 = vmatpush.msra.mxu3 %v3534_v5  ;;  %v643_v30 = vsub.f32 %v641_v17, %v642_v24  ;;  %v363_v35 = vand.u32 4294901760, %v362_v25 }
  0x32   : > { %352 = vmatpush.msra.mxu0 %v3541_v9  ;;  %v626_v32 = vand.u32 4294901760, %v625_v26  ;;  %795 = vmatpush.msra.mxu2 %v635_v15  ;;  %v632_v34 = vand.u32 4294901760, %v631_v28  ;;  %v371_v44 = vand.u32 4294901760, %v370_v41  ;;  %v378_v48 = vsub.f32 %v247_v42, %v3570_v45  ;;  %v214_v26 = vld [vmem:[%s3515_s26 + $0x50] sm:$0xff] }
  0x33   : > { %v356_v33 = vsub.f32 %v354_v21, %v355_v27  ;;  %979 = vmatpush.msra.mxu3 %v3541_v9  ;;  %v638_v37 = vand.u32 4294901760, %v637_v29  ;;  %v644_v39 = vand.u32 4294901760, %v643_v30  ;;  %v364_v40 = vsub.f32 %v362_v25, %v363_v35 }
  0x34   : > { %1188 = vmatpush.msrb.mxu0 %v624_v20  ;;  %627 = vmatpush.msra.mxu1 %v626_v32  ;;  %v372_v47 = vsub.f32 %v370_v41, %v371_v44  ;;  %v250_v49 = vsel %vm236_vm0, %v208_v46, 0  ;;  %v379_v51 = vand.u32 4294901760, %v378_v48  ;;  %v253_v56 = vsel %vm236_vm0, %v209_v53, 0 }
  0x35   : > { %v357_v36 = vand.u32 4294901760, %v356_v33  ;;  %798 = vmatpush.msra.mxu2 %v641_v17  ;;  %983 = vmatmul.f32.vlgmr.msra.gmra.mxu3 %v355_v27  ;;  %v365_v43 = vand.u32 4294901760, %v364_v40  ;;  %v3579_v52 = vand.u32 4294901760, %v250_v49  ;;  %v3586_v59 = vand.u32 4294901760, %v253_v56 }
  0x36   : > { %801 = vmatmul.f32.vlgmr.msra.gmra.mxu2 %v354_v21  ;;  %633 = vmatpush.msra.mxu1 %v632_v34  ;;  %v373_v50 = vand.u32 4294901760, %v372_v47  ;;  %v380_v54 = vsub.f32 %v378_v48, %v379_v51  ;;  %v256_v63 = vsel %vm236_vm0, %v210_v60, 0  ;;  %v262_v13 = vsel %vm236_vm0, %v212_v10, 0  ;;  %v215_v34 = vld [vmem:[%s3515_s26 + $0x58] sm:$0xff]  ;;  %v220_v10 = vld [vmem:[%s3515_s26 + $0x80] sm:$0xff] }
  0x37   : > { %358 = vmatmul.f32.vlgmr.msra.gmra.mxu0 %v357_v36  ;;  %v386_v55 = vsub.f32 %v250_v49, %v3579_v52  ;;  %v394_v62 = vsub.f32 %v253_v56, %v3586_v59  ;;  %v3592_v2 = vand.u32 4294901760, %v256_v63  ;;  %v3604_v17 = vand.u32 4294901760, %v262_v13  ;;  %v217_v49 = vld [vmem:[%s3515_s26 + $0x68] sm:$0xff] }
  0x38   : > { %1192 = vmatpush.msrb.mxu0 %v630_v22  ;;  %639 = vmatpush.msra.mxu1 %v638_v37  ;;  %v381_v57 = vand.u32 4294901760, %v380_v54  ;;  %v265_v22 = vsel %vm236_vm0, %v213_v19, 0  ;;  %v268_v29 = vsel %vm236_vm0, %v214_v26, 0  ;;  %v271_v37 = vsel %vm236_vm0, %v215_v34, 0 }
  0x39   : > { %v387_v58 = vand.u32 4294901760, %v386_v55  ;;  %v395_v1 = vand.u32 4294901760, %v394_v62  ;;  %v418_v21 = vsub.f32 %v262_v13, %v3604_v17  ;;  %v3616_v33 = vand.u32 4294901760, %v268_v29 }
  0x3a   : > { %1196 = vmatpush.msrb.mxu0 %v636_v23  ;;  %645 = vmatpush.msra.mxu1 %v644_v39  ;;  %v3622_v40 = vand.u32 4294901760, %v271_v37  ;;  %v277_v53 = vsel %vm236_vm0, %v217_v49, 0  ;;  %v286_v13 = vsel %vm236_vm0, %v220_v10, 0 }
  0x3b   : > { %647 = vmatmul.f32.vlgmr.msra.gmra.mxu1 %v3551_v16  ;;  %v388_v61 = vsub.f32 %v386_v55, %v387_v58  ;;  %v434_v36 = vsub.f32 %v268_v29, %v3616_v33  ;;  %v3634_v56 = vand.u32 4294901760, %v277_v53  ;;  %v3652_v19 = vand.u32 4294901760, %v286_v13 }
  0x3c   : > { %1200 = vmatpush.msrb.mxu0 %v642_v24  ;;  %1343 = vmatpush.msrb.mxu1 %v3530_v3  ;;  %v211_v3 = vld [vmem:[%s3515_s26 + $0x38] sm:$0xff]  ;;  %v419_v24 = vand.u32 4294901760, %v418_v21 }
  0x3d   : > { %989 = vmatmul.f32.gmra.mxu3 %v363_v35  ;;  %v389_v0 = vand.u32 4294901760, %v388_v61  ;;  %v259_v6 = vsel %vm236_vm0, %v211_v3, 0  ;;  %v435_v39 = vand.u32 4294901760, %v434_v36  ;;  %v458_v60 = vsub.f32 %v277_v53, %v3634_v56 }
  0x3e   : > { %806 = vmatmul.f32.gmra.mxu2 %v362_v25  ;;  %1345 = vmatpush.msrb.mxu1 %v3532_v4  ;;  %v396_v4 = vsub.f32 %v394_v62, %v395_v1  ;;  %v3610_v25 = vand.u32 4294901760, %v265_v22  ;;  %v420_v27 = vsub.f32 %v418_v21, %v419_v24 }
  0x3f   : > { %366 = vmatmul.f32.gmra.mxu0 %v365_v43  ;;  %v436_v42 = vsub.f32 %v434_v36, %v435_v39  ;;  %v442_v43 = vsub.f32 %v271_v37, %v3622_v40 }
  0x40   : > { %1347 = vmatpush.msrb.mxu1 %v3534_v5  ;;  %v402_v5 = vsub.f32 %v256_v63, %v3592_v2  ;;  %v397_v7 = vand.u32 4294901760, %v396_v4  ;;  %v426_v28 = vsub.f32 %v265_v22, %v3610_v25  ;;  %v421_v30 = vand.u32 4294901760, %v420_v27 }
  0x41   : > { %v437_v46 = vand.u32 4294901760, %v436_v42  ;;  %v443_v47 = vand.u32 4294901760, %v442_v43  ;;  %v459_v63 = vand.u32 4294901760, %v458_v60  ;;  %v482_v22 = vsub.f32 %v286_v13, %v3652_v19 }
  0x42   : > { %1349 = vmatpush.msrb.mxu1 %v3541_v9  ;;  %v403_v8 = vand.u32 4294901760, %v402_v5  ;;  %v3598_v9 = vand.u32 4294901760, %v259_v6  ;;  %v427_v32 = vand.u32 4294901760, %v426_v28 }
  0x43   : > { %651 = vmatmul.f32.gmra.mxu1 %v3554_v18  ;;  %v460_v3 = vsub.f32 %v458_v60, %v459_v63  ;;  %v483_v26 = vand.u32 4294901760, %v482_v22 }
  0x44   : > { %v404_v11 = vsub.f32 %v402_v5, %v403_v8  ;;  %v410_v12 = vsub.f32 %v259_v6, %v3598_v9  ;;  %v428_v35 = vsub.f32 %v426_v28, %v427_v32 }
  0x45   : > { %995 = vmatmul.f32.gmra.mxu3 %v371_v44  ;;  %v461_v6 = vand.u32 4294901760, %v460_v3  ;;  %v484_v29 = vsub.f32 %v482_v22, %v483_v26 }
  0x46   : > { %811 = vmatmul.f32.gmra.mxu2 %v370_v41  ;;  %v405_v14 = vand.u32 4294901760, %v404_v11  ;;  %v411_v15 = vand.u32 4294901760, %v410_v12  ;;  %v429_v38 = vand.u32 4294901760, %v428_v35  ;;  %v216_v41 = vld [vmem:[%s3515_s26 + $0x60] sm:$0xff] }
  0x47   : > { %374 = vmatmul.f32.gmra.mxu0 %v373_v50  ;;  %v274_v44 = vsel %vm236_vm0, %v216_v41, 0  ;;  %v444_v50 = vsub.f32 %v442_v43, %v443_v47  ;;  %v485_v34 = vand.u32 4294901760, %v484_v29 }
  0x48   : > { %v412_v20 = vsub.f32 %v410_v12, %v411_v15 }
  0x49   : > { %v445_v54 = vand.u32 4294901760, %v444_v50 }
  0x4a   : > { %v413_v23 = vand.u32 4294901760, %v412_v20  ;;  %v221_v20 = vld [vmem:[%s3515_s26 + $0x88] sm:$0xff] }
  0x4b   : > { %655 = vmatmul.f32.gmra.mxu1 %v3563_v31 }
  0x4d   : > { %1001 = vmatmul.f32.gmra.mxu3 %v379_v51 }
  0x4e   : > { %816 = vmatmul.f32.gmra.mxu2 %v378_v48  ;;  %v3628_v48 = vand.u32 4294901760, %v274_v44 }
  0x4f   : > { %382 = vmatmul.f32.gmra.mxu0 %v381_v57  ;;  %v218_v57 = vld [vmem:[%s3515_s26 + $0x70] sm:$0xff] }
  0x50   : > { %v450_v51 = vsub.f32 %v274_v44, %v3628_v48  ;;  %v280_v61 = vsel %vm236_vm0, %v218_v57, 0 }
  0x53   : > { %659 = vmatmul.f32.gmra.mxu1 %v3570_v45 }
  0x55   : > { %1007 = vmatmul.f32.gmra.mxu3 %v387_v58 }
  0x56   : > { %821 = vmatmul.f32.gmra.mxu2 %v386_v55  ;;  %v451_v55 = vand.u32 4294901760, %v450_v51 }
  0x57   : > { %390 = vmatmul.f32.gmra.mxu0 %v389_v0  ;;  %v3640_v0 = vand.u32 4294901760, %v280_v61 }
  0x58   : > { %v452_v58 = vsub.f32 %v450_v51, %v451_v55 }
  0x59   : > { %v466_v4 = vsub.f32 %v280_v61, %v3640_v0 }
  0x5b   : > { %663 = vmatmul.f32.gmra.mxu1 %v3579_v52 }
  0x5d   : > { %1013 = vmatmul.f32.gmra.mxu3 %v395_v1  ;;  %v219_v1 = vld [vmem:[%s3515_s26 + $0x78] sm:$0xff] }
  0x5e   : > { %826 = vmatmul.f32.gmra.mxu2 %v394_v62  ;;  %v453_v62 = vand.u32 4294901760, %v452_v58 }
  0x5f   : > { %398 = vmatmul.f32.gmra.mxu0 %v397_v7  ;;  %v467_v7 = vand.u32 4294901760, %v466_v4 }
  0x61   : > { %v468_v11 = vsub.f32 %v466_v4, %v467_v7 }
  0x63   : > { %667 = vmatmul.f32.gmra.mxu1 %v3586_v59 }
  0x65   : > { %1019 = vmatmul.f32.gmra.mxu3 %v403_v8 }
  0x66   : > { %831 = vmatmul.f32.gmra.mxu2 %v402_v5  ;;  %v283_v5 = vsel %vm236_vm0, %v219_v1, 0 }
  0x67   : > { %406 = vmatmul.f32.gmra.mxu0 %v405_v14  ;;  %v3646_v8 = vand.u32 4294901760, %v283_v5  ;;  %v469_v14 = vand.u32 4294901760, %v468_v11  ;;  %v225_v11 = vld [vmem:[%s3515_s26 + $0xa8] sm:$0xff] }
  0x6b   : > { %671 = vmatmul.f32.gmra.mxu1 %v3592_v2 }
  0x6d   : > { %1025 = vmatmul.f32.gmra.mxu3 %v411_v15 }
  0x6e   : > { %836 = vmatmul.f32.gmra.mxu2 %v410_v12  ;;  %v474_v12 = vsub.f32 %v283_v5, %v3646_v8 }
  0x6f   : > { %414 = vmatmul.f32.gmra.mxu0 %v413_v23  ;;  %v289_v23 = vsel %vm236_vm0, %v221_v20, 0 }
  0x70   : > { %v475_v15 = vand.u32 4294901760, %v474_v12  ;;  %v3658_v27 = vand.u32 4294901760, %v289_v23 }
  0x73   : > { %675 = vmatmul.f32.gmra.mxu1 %v3598_v9 }
  0x75   : > { %1031 = vmatmul.f32.gmra.mxu3 %v419_v24 }
  0x76   : > { %841 = vmatmul.f32.gmra.mxu2 %v418_v21  ;;  %v476_v21 = vsub.f32 %v474_v12, %v475_v15 }
  0x77   : > { %422 = vmatmul.f32.gmra.mxu0 %v421_v30  ;;  %v490_v30 = vsub.f32 %v289_v23, %v3658_v27 }
  0x78   : > { %v477_v24 = vand.u32 4294901760, %v476_v21 }
  0x79   : > { %v491_v35 = vand.u32 4294901760, %v490_v30 }
  0x7b   : > { %679 = vmatmul.f32.gmra.mxu1 %v3604_v17 }
  0x7d   : > { %1037 = vmatmul.f32.gmra.mxu3 %v427_v32 }
  0x7e   : > { %846 = vmatmul.f32.gmra.mxu2 %v426_v28  ;;  %v222_v28 = vld [vmem:[%s3515_s26 + $0x90] sm:$0xff] }
  0x7f   : > { %430 = vmatmul.f32.gmra.mxu0 %v429_v38  ;;  %v292_v32 = vsel %vm236_vm0, %v222_v28, 0  ;;  %v223_v38 = vld [vmem:[%s3515_s26 + $0x98] sm:$0xff] }
  0x80   : > { %v295_v42 = vsel %vm236_vm0, %v223_v38, 0 }
  0x83   : > { %683 = vmatmul.f32.gmra.mxu1 %v3610_v25 }
  0x85   : > { %1043 = vmatmul.f32.gmra.mxu3 %v435_v39  ;;  %v492_v39 = vsub.f32 %v490_v30, %v491_v35 }
  0x86   : > { %851 = vmatmul.f32.gmra.mxu2 %v434_v36  ;;  %v3664_v36 = vand.u32 4294901760, %v292_v32 }
  0x87   : > { %438 = vmatmul.f32.gmra.mxu0 %v437_v46  ;;  %v493_v49 = vand.u32 4294901760, %v492_v39 }
  0x88   : > { %v498_v41 = vsub.f32 %v292_v32, %v3664_v36  ;;  %v226_v32 = vld [vmem:[%s3515_s26 + $0xb0] sm:$0xff] }
  0x89   : > { %v304_v38 = vsel %vm236_vm0, %v226_v32, 0 }
  0x8a   : > { %v499_v50 = vand.u32 4294901760, %v498_v41 }
  0x8b   : > { %687 = vmatmul.f32.gmra.mxu1 %v3616_v33 }
  0x8c   : > { %v500_v58 = vsub.f32 %v498_v41, %v499_v50 }
  0x8d   : > { %1049 = vmatmul.f32.gmra.mxu3 %v443_v47 }
  0x8e   : > { %856 = vmatmul.f32.gmra.mxu2 %v442_v43 }
  0x8f   : > { %446 = vmatmul.f32.gmra.mxu0 %v445_v54 }
  0x93   : > { %691 = vmatmul.f32.gmra.mxu1 %v3622_v40 }
  0x95   : > { %1055 = vmatmul.f32.gmra.mxu3 %v451_v55  ;;  %v224_v55 = vld [vmem:[%s3515_s26 + $0xa0] sm:$0xff] }
  0x96   : > { %861 = vmatmul.f32.gmra.mxu2 %v450_v51  ;;  %v3670_v51 = vand.u32 4294901760, %v295_v42  ;;  %v298_v61 = vsel %vm236_vm0, %v224_v55, 0 }
  0x97   : > { %454 = vmatmul.f32.gmra.mxu0 %v453_v62 }
  0x9b   : > { %695 = vmatmul.f32.gmra.mxu1 %v3628_v48 }
  0x9d   : > { %1061 = vmatmul.f32.gmra.mxu3 %v459_v63 }
  0x9e   : > { %866 = vmatmul.f32.gmra.mxu2 %v458_v60  ;;  %v506_v60 = vsub.f32 %v295_v42, %v3670_v51 }
  0x9f   : > { %462 = vmatmul.f32.gmra.mxu0 %v461_v6  ;;  %v3678_v6 = vand.u32 4294901760, %v298_v61 }
  0xa0   : > { %v507_v5 = vand.u32 4294901760, %v506_v60 }
  0xa2   : > { %v508_v13 = vsub.f32 %v506_v60, %v507_v5 }
  0xa3   : > { %699 = vmatmul.f32.gmra.mxu1 %v3634_v56 }
  0xa5   : > { %1067 = vmatmul.f32.gmra.mxu3 %v467_v7 }
  0xa6   : > { %871 = vmatmul.f32.gmra.mxu2 %v466_v4  ;;  %v501_v4 = vand.u32 4294901760, %v500_v58 }
  0xa7   : > { %470 = vmatmul.f32.gmra.mxu0 %v469_v14  ;;  %v514_v14 = vsub.f32 %v298_v61, %v3678_v6 }
  0xab   : > { %703 = vmatmul.f32.gmra.mxu1 %v3640_v0 }
  0xad   : > { %1073 = vmatmul.f32.gmra.mxu3 %v475_v15  ;;  %v301_v15 = vsel %vm236_vm0, %v225_v11, 0  ;;  %v228_v11 = vld [vmem:[%s3515_s26 + $0xc0] sm:$0xff] }
  0xae   : > { %876 = vmatmul.f32.gmra.mxu2 %v474_v12  ;;  %v3686_v28 = vand.u32 4294901760, %v301_v15 }
  0xaf   : > { %478 = vmatmul.f32.gmra.mxu0 %v477_v24  ;;  %v509_v24 = vand.u32 4294901760, %v508_v13 }
  0xb3   : > { %707 = vmatmul.f32.gmra.mxu1 %v3646_v8 }
  0xb4   : > { %v359_v37 = vpop.f32.mrf.mxu0 }
  0xb5   : > { %1079 = vmatmul.f32.gmra.mxu3 %v483_v26  ;;  %v515_v26 = vand.u32 4294901760, %v514_v14 }
  0xb6   : > { %881 = vmatmul.f32.gmra.mxu2 %v482_v22 }
  0xb7   : > { %486 = vmatmul.f32.gmra.mxu0 %v485_v34 }
  0xb8   : > { %v648_v43 = vpop.f32.mrf.mxu1  ;;  %v984_v47 = vpop.f32.mrf.mxu3 }
  0xb9   : > { %v802_v44 = vpop.f32.mrf.mxu2  ;;  %v649_v46 = vadd.f32 %v648_v43, %v359_v37  ;;  %v522_v37 = vsub.f32 %v301_v15, %v3686_v28 }
  0xbb   : > { %v803_v54 = vadd.f32 %v802_v44, %v649_v46  ;;  %711 = vmatmul.f32.gmra.mxu1 %v3652_v19  ;;  %v523_v46 = vand.u32 4294901760, %v522_v37 }
  0xbc   : > { %v367_v53 = vpop.f32.mrf.mxu0 }
  0xbd   : > { %v3674_v57 = vadd.f32 %v984_v47, %v803_v54  ;;  %1085 = vmatmul.f32.gmra.mxu3 %v491_v35  ;;  %v516_v35 = vsub.f32 %v514_v14, %v515_v26  ;;  %v3694_v47 = vand.u32 4294901760, %v304_v38  ;;  %v524_v55 = vsub.f32 %v522_v37, %v523_v46 }
  0xbe   : > { %886 = vmatmul.f32.gmra.mxu2 %v490_v30 }
  0xbf   : > { %494 = vmatmul.f32.gmra.mxu0 %v493_v49  ;;  %v517_v44 = vand.u32 4294901760, %v516_v35  ;;  %v530_v58 = vsub.f32 %v304_v38, %v3694_v47 }
  0xc0   : > { %v652_v62 = vpop.f32.mrf.mxu1  ;;  %v990_v3 = vpop.f32.mrf.mxu3 }
  0xc1   : > { %v807_v63 = vpop.f32.mrf.mxu2  ;;  %v653_v1 = vadd.f32 %v652_v62, %v367_v53  ;;  %v227_v53 = vld [vmem:[%s3515_s26 + $0xb8] sm:$0xff] }
  0xc3   : > { %v808_v10 = vadd.f32 %v807_v63, %v653_v1  ;;  %715 = vmatmul.f32.gmra.mxu1 %v3658_v27 }
  0xc4   : > { %v375_v7 = vpop.f32.mrf.mxu0 }
  0xc5   : > { %v3682_v12 = vadd.f32 %v990_v3, %v808_v10  ;;  %1091 = vmatmul.f32.gmra.mxu3 %v499_v50  ;;  %v525_v3 = vand.u32 4294901760, %v524_v55 }
  0xc6   : > { %891 = vmatmul.f32.gmra.mxu2 %v498_v41 }
  0xc7   : > { %502 = vmatmul.f32.gmra.mxu0 %v501_v4  ;;  %v531_v4 = vand.u32 4294901760, %v530_v58 }
  0xc8   : > { %v656_v20 = vpop.f32.mrf.mxu1  ;;  %v996_v23 = vpop.f32.mrf.mxu3 }
  0xc9   : > { %v812_v21 = vpop.f32.mrf.mxu2  ;;  %v657_v22 = vadd.f32 %v656_v20, %v375_v7  ;;  %v310_v20 = vsel %vm236_vm0, %v228_v11, 0 }
  0xcb   : > { %v813_v30 = vadd.f32 %v812_v21, %v657_v22  ;;  %719 = vmatmul.f32.gmra.mxu1 %v3664_v36 }
  0xcc   : > { %v383_v29 = vpop.f32.mrf.mxu0 }
  0xcd   : > { %v3690_v34 = vadd.f32 %v996_v23, %v813_v30  ;;  %1097 = vmatmul.f32.gmra.mxu3 %v507_v5  ;;  %v3710_v30 = vand.u32 4294901760, %v310_v20 }
  0xce   : > { %896 = vmatmul.f32.gmra.mxu2 %v506_v60  ;;  %v307_v60 = vsel %vm236_vm0, %v227_v53, 0 }
  0xcf   : > { %510 = vmatmul.f32.gmra.mxu0 %v509_v24  ;;  %v3702_v5 = vand.u32 4294901760, %v307_v60 }
  0xd0   : > { %v660_v39 = vpop.f32.mrf.mxu1  ;;  %v1002_v43 = vpop.f32.mrf.mxu3 }
  0xd1   : > { %v817_v41 = vpop.f32.mrf.mxu2  ;;  %v661_v42 = vadd.f32 %v660_v39, %v383_v29  ;;  %v538_v15 = vsub.f32 %v307_v60, %v3702_v5 }
  0xd3   : > { %v818_v50 = vadd.f32 %v817_v41, %v661_v42  ;;  %723 = vmatmul.f32.gmra.mxu1 %v3670_v51  ;;  %v539_v29 = vand.u32 4294901760, %v538_v15  ;;  %v546_v41 = vsub.f32 %v310_v20, %v3710_v30 }
  0xd4   : > { %v391_v49 = vpop.f32.mrf.mxu0 }
  0xd5   : > { %v3698_v54 = vadd.f32 %v1002_v43, %v818_v50  ;;  %1103 = vmatmul.f32.gmra.mxu3 %v515_v26  ;;  %v540_v39 = vsub.f32 %v538_v15, %v539_v29  ;;  %v547_v53 = vand.u32 4294901760, %v546_v41 }
  0xd6   : > { %901 = vmatmul.f32.gmra.mxu2 %v514_v14  ;;  %v532_v14 = vsub.f32 %v530_v58, %v531_v4 }
  0xd7   : > { %518 = vmatmul.f32.gmra.mxu0 %v517_v44  ;;  %v541_v50 = vand.u32 4294901760, %v540_v39 }
  0xd8   : > { %v664_v61 = vpop.f32.mrf.mxu1  ;;  %v1008_v1 = vpop.f32.mrf.mxu3  ;;  %v533_v26 = vand.u32 4294901760, %v532_v14 }
  0xd9   : > { %v822_v62 = vpop.f32.mrf.mxu2  ;;  %v665_v63 = vadd.f32 %v664_v61, %v391_v49 }
  0xdb   : > { %v823_v10 = vadd.f32 %v822_v62, %v665_v63  ;;  %727 = vmatmul.f32.gmra.mxu1 %v3678_v6  ;;  %v548_v63 = vsub.f32 %v546_v41, %v547_v53 }
  0xdc   : > { %v399_v7 = vpop.f32.mrf.mxu0 }
  0xdd   : > { %v3706_v13 = vadd.f32 %v1008_v1, %v823_v10  ;;  %1109 = vmatmul.f32.gmra.mxu3 %v523_v46  ;;  %v549_v14 = vand.u32 4294901760, %v548_v63  ;;  %v233_v63 = vld [vmem:[%s3515_s26 + $0xe8] sm:$0xff] }
  0xde   : > { %906 = vmatmul.f32.gmra.mxu2 %v522_v37  ;;  %v229_v37 = vld [vmem:[%s3515_s26 + $0xc8] sm:$0xff] }
  0xdf   : > { %526 = vmatmul.f32.gmra.mxu0 %v525_v3  ;;  %v313_v42 = vsel %vm236_vm0, %v229_v37, 0 }
  0xe0   : > { %v668_v21 = vpop.f32.mrf.mxu1  ;;  %v1014_v24 = vpop.f32.mrf.mxu3  ;;  %v3718_v55 = vand.u32 4294901760, %v313_v42 }
  0xe1   : > { %v827_v22 = vpop.f32.mrf.mxu2  ;;  %v669_v23 = vadd.f32 %v668_v21, %v399_v7 }
  0xe2   : > { %v554_v1 = vsub.f32 %v313_v42, %v3718_v55 }
  0xe3   : > { %v828_v35 = vadd.f32 %v827_v22, %v669_v23  ;;  %731 = vmatmul.f32.gmra.mxu1 %v3686_v28 }
  0xe4   : > { %v407_v32 = vpop.f32.mrf.mxu0  ;;  %v555_v20 = vand.u32 4294901760, %v554_v1 }
  0xe5   : > { %v3714_v38 = vadd.f32 %v1014_v24, %v828_v35  ;;  %1115 = vmatmul.f32.gmra.mxu3 %v531_v4 }
  0xe6   : > { %911 = vmatmul.f32.gmra.mxu2 %v530_v58  ;;  %v230_v58 = vld [vmem:[%s3515_s26 + $0xd0] sm:$0xff] }
  0xe7   : > { %534 = vmatmul.f32.gmra.mxu0 %v533_v26  ;;  %v316_v3 = vsel %vm236_vm0, %v230_v58, 0  ;;  %v556_v26 = vsub.f32 %v554_v1, %v555_v20 }
  0xe8   : > { %v672_v43 = vpop.f32.mrf.mxu1  ;;  %v1020_v49 = vpop.f32.mrf.mxu3  ;;  %v3726_v21 = vand.u32 4294901760, %v316_v3 }
  0xe9   : > { %v832_v44 = vpop.f32.mrf.mxu2  ;;  %v673_v46 = vadd.f32 %v672_v43, %v407_v32  ;;  %v557_v37 = vand.u32 4294901760, %v556_v26 }
  0xeb   : > { %v833_v61 = vadd.f32 %v832_v44, %v673_v46  ;;  %735 = vmatmul.f32.gmra.mxu1 %v3694_v47  ;;  %v232_v44 = vld [vmem:[%s3515_s26 + $0xe0] sm:$0xff] }
  0xec   : > { %v415_v60 = vpop.f32.mrf.mxu0 }
  0xed   : > { %v3722_v62 = vadd.f32 %v1020_v49, %v833_v61  ;;  %1121 = vmatmul.f32.gmra.mxu3 %v539_v29  ;;  %v562_v29 = vsub.f32 %v316_v3, %v3726_v21  ;;  %v322_v49 = vsel %vm236_vm0, %v232_v44, 0 }
  0xee   : > { %916 = vmatmul.f32.gmra.mxu2 %v538_v15  ;;  %v231_v15 = vld [vmem:[%s3515_s26 + $0xd8] sm:$0xff]  ;;  %v3748_v61 = vand.u32 4294901760, %v322_v49 }
  0xef   : > { %542 = vmatmul.f32.gmra.mxu0 %v541_v50  ;;  %v319_v32 = vsel %vm236_vm0, %v231_v15, 0  ;;  %v563_v39 = vand.u32 4294901760, %v562_v29 }
  0xf0   : > { %v676_v4 = vpop.f32.mrf.mxu1  ;;  %v1026_v11 = vpop.f32.mrf.mxu3  ;;  %v3738_v42 = vand.u32 4294901760, %v319_v32  ;;  %v578_v3 = vsub.f32 %v322_v49, %v3748_v61  ;;  %v235_v49 = vld [vmem:[%s3515_s26 + $0xf8] sm:$0xff] }
  0xf1   : > { %v837_v7 = vpop.f32.mrf.mxu2  ;;  %v677_v10 = vadd.f32 %v676_v4, %v415_v60  ;;  %v325_v4 = vsel %vm236_vm0, %v233_v63, 0 }
  0xf2   : > { %v570_v46 = vsub.f32 %v319_v32, %v3738_v42 }
  0xf3   : > { %v838_v23 = vadd.f32 %v837_v7, %v677_v10  ;;  %739 = vmatmul.f32.gmra.mxu1 %v3702_v5 }
  0xf4   : > { %v3728_v22 = vpop.f32.mrf.mxu0  ;;  %v571_v60 = vand.u32 4294901760, %v570_v46 }
  0xf5   : > { %v3732_v24 = vadd.f32 %v1026_v11, %v838_v23  ;;  %1127 = vmatmul.f32.gmra.mxu3 %v547_v53  ;;  %v579_v11 = vand.u32 4294901760, %v578_v3  ;;  %v234_v23 = vld [vmem:[%s3515_s26 + $0xf0] sm:$0xff] }
  0xf6   : > { %921 = vmatmul.f32.gmra.mxu2 %v546_v41  ;;  %v564_v41 = vsub.f32 %v562_v29, %v563_v39 }
  0xf7   : > { %550 = vmatmul.f32.gmra.mxu0 %v549_v14  ;;  %v3758_v14 = vand.u32 4294901760, %v325_v4  ;;  %v580_v15 = vsub.f32 %v578_v3, %v579_v11 }
  0xf8   : > { %v3736_v35 = vpop.f32.mrf.mxu1  ;;  %v565_v53 = vand.u32 4294901760, %v564_v41 }
  0xf9   : > { %v586_v26 = vsub.f32 %v325_v4, %v3758_v14 }
  0xfb   : > { %743 = vmatmul.f32.gmra.mxu1 %v3710_v30 }
  0xfc   : > { %v3740_v43 = vpop.f32.mrf.mxu0 }
  0xfd   : > { %1133 = vmatmul.f32.gmra.mxu3 %v555_v20 }
  0xfe   : > { %926 = vmatmul.f32.gmra.mxu2 %v554_v1  ;;  %v572_v1 = vsub.f32 %v570_v46, %v571_v60 }
  0xff   : > { %558 = vmatmul.f32.gmra.mxu0 %v557_v37  ;;  %v581_v37 = vand.u32 4294901760, %v580_v15 }
 0x100   : > { %v3746_v50 = vpop.f32.mrf.mxu1  ;;  %v573_v10 = vand.u32 4294901760, %v572_v1 }
 0x103   : > { %747 = vmatmul.f32.gmra.mxu1 %v3718_v55 }
 0x104   : > { %v3750_v58 = vpop.f32.mrf.mxu0 }
 0x105   : > { %1139 = vmatmul.f32.gmra.mxu3 %v563_v39  ;;  %v587_v39 = vand.u32 4294901760, %v586_v26 }
 0x106   : > { %931 = vmatmul.f32.gmra.mxu2 %v562_v29  ;;  %v328_v29 = vsel %vm236_vm0, %v234_v23, 0 }
 0x107   : > { %566 = vmatmul.f32.gmra.mxu0 %v565_v53  ;;  %v3768_v44 = vand.u32 4294901760, %v328_v29 }
 0x108   : > { %v3756_v7 = vpop.f32.mrf.mxu1 }
 0x109   : > { %v594_v53 = vsub.f32 %v328_v29, %v3768_v44 }
 0x10b   : > { %751 = vmatmul.f32.gmra.mxu1 %v3726_v21  ;;  %v595_v4 = vand.u32 4294901760, %v594_v53 }
 0x10c   : > { %v3760_v20 = vpop.f32.mrf.mxu0 }
 0x10d   : > { %1145 = vmatmul.f32.gmra.mxu3 %v571_v60  ;;  %v331_v60 = vsel %vm236_vm0, %v235_v49, 0 }
 0x10e   : > { %936 = vmatmul.f32.gmra.mxu2 %v570_v46  ;;  %v588_v46 = vsub.f32 %v586_v26, %v587_v39 }
 0x10f   : > { %574 = vmatmul.f32.gmra.mxu0 %v573_v10  ;;  %v3778_v10 = vand.u32 4294901760, %v331_v60 }
 0x110   : > { %v3766_v32 = vpop.f32.mrf.mxu1  ;;  %v589_v1 = vand.u32 4294901760, %v588_v46 }
 0x111   : > { %4826 = vst [vmem:[#allocation7_spill] sm:$0xff] %v3778_v10 }
 0x113   : > { %755 = vmatmul.f32.gmra.mxu1 %v3738_v42 }
 0x114   : > { %v3770_v41 = vpop.f32.mrf.mxu0 }
 0x115   : > { %4824 = vst [vmem:[#allocation5_spill] sm:$0xff] %v3770_v41  ;;  %1151 = vmatmul.f32.gmra.mxu3 %v579_v11  ;;  %v602_v11 = vsub.f32 %v331_v60, %v3778_v10 }
 0x116   : > { %941 = vmatmul.f32.gmra.mxu2 %v578_v3  ;;  %v596_v3 = vsub.f32 %v594_v53, %v595_v4 }
 0x117   : > { %582 = vmatmul.f32.gmra.mxu0 %v581_v37  ;;  %v603_v37 = vand.u32 4294901760, %v602_v11 }
 0x118   : > { %v3776_v63 = vpop.f32.mrf.mxu1  ;;  %v597_v29 = vand.u32 4294901760, %v596_v3 }
 0x119   : > { %4825 = vst [vmem:[#allocation6_spill] sm:$0xff] %v3776_v63  ;;  %v604_v46 = vsub.f32 %v602_v11, %v603_v37 }
 0x11b   : > { %759 = vmatmul.f32.gmra.mxu1 %v3748_v61 }
 0x11c   : > { %v3780_v23 = vpop.f32.mrf.mxu0 }
 0x11d   : > { %4827 = vst [vmem:[#allocation8_spill] sm:$0xff] %v3780_v23  ;;  %1157 = vmatmul.f32.gmra.mxu3 %v587_v39 }
 0x11e   : > { %946 = vmatmul.f32.gmra.mxu2 %v586_v26  ;;  %v605_v26 = vand.u32 4294901760, %v604_v46 }
 0x11f   : > { %590 = vmatmul.f32.gmra.mxu0 %v589_v1 }
 0x120   : > { %v3784_v15 = vpop.f32.mrf.mxu1 }
 0x121   : > { %4828 = vst [vmem:[#allocation9_spill] sm:$0xff] %v3784_v15 }
 0x123   : > { %763 = vmatmul.f32.gmra.mxu1 %v3758_v14 }
 0x124   : > { %v3786_v49 = vpop.f32.mrf.mxu0 }
 0x125   : > { %4829 = vst [vmem:[#allocation10_spill] sm:$0xff] %v3786_v49  ;;  %1163 = vmatmul.f32.gmra.mxu3 %v595_v4 }
 0x126   : > { %951 = vmatmul.f32.gmra.mxu2 %v594_v53 }
 0x127   : > { %598 = vmatmul.f32.gmra.mxu0 %v597_v29 }
 0x128   : > { %v3789_v63 = vpop.f32.mrf.mxu1 }
 0x129   : > { %4830 = vst [vmem:[#allocation11_spill] sm:$0xff] %v3789_v63 }
 0x12b   : > { %767 = vmatmul.f32.gmra.mxu1 %v3768_v44 }
 0x12c   : > { %v3791_v39 = vpop.f32.mrf.mxu0 }
 0x12d   : > { %4831 = vst [vmem:[#allocation12_spill] sm:$0xff] %v3791_v39  ;;  %1169 = vmatmul.f32.gmra.mxu3 %v603_v37 }
 0x12e   : > { %956 = vmatmul.f32.gmra.mxu2 %v602_v11 }
 0x12f   : > { %606 = vmatmul.f32.gmra.mxu0 %v605_v26 }
 0x130   : > { %v3794_v60 = vpop.f32.mrf.mxu1 }
 0x131   : > { %4832 = vst [vmem:[#allocation13_spill] sm:$0xff] %v3794_v60 }
 0x133   : > { %771 = vmatmul.f32.gmra.mxu1 %v3778_v10 }
 0x134   : > { %v3796_v1 = vpop.f32.mrf.mxu0 }
 0x137   : > { %1202 = vmatmul.f32.vlgmr.msrb.gmra.mxu0 %v3551_v16 }
 0x138   : > { %v3800_v53 = vpop.f32.mrf.mxu1 }
 0x139   : > { %4833 = vst [vmem:[#allocation14_spill] sm:$0xff] %v3800_v53 }
 0x13b   : > { %1351 = vmatmul.f32.vlgmr.msrb.gmra.mxu1 %v3551_v16 }
 0x13c   : > { %v3802_v4 = vpop.f32.mrf.mxu0 }
 0x13d   : > { %4834 = vst [vmem:[#allocation15_spill] sm:$0xff] %v3802_v4 }
 0x13f   : > { %1206 = vmatmul.f32.gmra.mxu0 %v3554_v18 }
 0x140   : > { %v3806_v3 = vpop.f32.mrf.mxu1 }
 0x141   : > { %4835 = vst [vmem:[#allocation16_spill] sm:$0xff] %v3806_v3 }
 0x143   : > { %1355 = vmatmul.f32.gmra.mxu1 %v3554_v18 }
 0x144   : > { %v3808_v11 = vpop.f32.mrf.mxu0 }
 0x145   : > { %4836 = vst [vmem:[#allocation17_spill] sm:$0xff] %v3808_v11 }
 0x147   : > { %1210 = vmatmul.f32.gmra.mxu0 %v3563_v31 }
 0x148   : > { %v3812_v29 = vpop.f32.mrf.mxu1 }
 0x149   : > { %4837 = vst [vmem:[#allocation18_spill] sm:$0xff] %v3812_v29  ;;  %v3852_v29 = vpop.f32.mrf.mxu3 }
 0x14b   : > { %1359 = vmatmul.f32.gmra.mxu1 %v3563_v31 }
 0x14c   : > { %v3814_v37 = vpop.f32.mrf.mxu0 }
 0x14d   : > { %4838 = vst [vmem:[#allocation19_spill] sm:$0xff] %v3814_v37 }
 0x14f   : > { %1214 = vmatmul.f32.gmra.mxu0 %v3570_v45 }
 0x150   : > { %v3818_v46 = vpop.f32.mrf.mxu1 }
 0x151   : > { %4839 = vst [vmem:[#allocation20_spill] sm:$0xff] %v3818_v46 }
 0x153   : > { %1363 = vmatmul.f32.gmra.mxu1 %v3570_v45 }
 0x154   : > { %v3820_v16 = vpop.f32.mrf.mxu0 }
 0x155   : > { %4840 = vst [vmem:[#allocation21_spill] sm:$0xff] %v3820_v16 }
 0x157   : > { %1218 = vmatmul.f32.gmra.mxu0 %v3579_v52 }
 0x158   : > { %v3824_v26 = vpop.f32.mrf.mxu1 }
 0x159   : > { %4841 = vst [vmem:[#allocation22_spill] sm:$0xff] %v3824_v26 }
 0x15b   : > { %1367 = vmatmul.f32.gmra.mxu1 %v3579_v52  ;;  %v3844_v52 = vpop.f32.mrf.mxu2 }
 0x15c   : > { %v3826_v18 = vpop.f32.mrf.mxu0 }
 0x15d   : > { %4842 = vst [vmem:[#allocation23_spill] sm:$0xff] %v3826_v18 }
 0x15f   : > { %1222 = vmatmul.f32.gmra.mxu0 %v3586_v59 }
 0x160   : > { %v3830_v3 = vpop.f32.mrf.mxu1 }
 0x161   : > { %4843 = vst [vmem:[#allocation24_spill] sm:$0xff] %v3830_v3 }
 0x163   : > { %1371 = vmatmul.f32.gmra.mxu1 %v3586_v59  ;;  %v3854_v11 = vpop.f32.mrf.mxu2 }
 0x164   : > { %v3832_v31 = vpop.f32.mrf.mxu0 }
 0x165   : > { %4844 = vst [vmem:[#allocation25_spill] sm:$0xff] %v3832_v31 }
 0x167   : > { %1226 = vmatmul.f32.gmra.mxu0 %v3592_v2 }
 0x168   : > { %v3836_v4 = vpop.f32.mrf.mxu1 }
 0x169   : > { %4845 = vst [vmem:[#allocation26_spill] sm:$0xff] %v3836_v4 }
 0x16b   : > { %1375 = vmatmul.f32.gmra.mxu1 %v3592_v2 }
 0x16c   : > { %v3838_v45 = vpop.f32.mrf.mxu0 }
 0x16d   : > { %4846 = vst [vmem:[#allocation27_spill] sm:$0xff] %v3838_v45 }
 0x16f   : > { %1230 = vmatmul.f32.gmra.mxu0 %v3598_v9 }
 0x170   : > { %v3842_v26 = vpop.f32.mrf.mxu1 }
 0x171   : > { %4847 = vst [vmem:[#allocation28_spill] sm:$0xff] %v3842_v26 }
 0x173   : > { %1379 = vmatmul.f32.gmra.mxu1 %v3598_v9  ;;  %v3865_v9 = vpop.f32.mrf.mxu3 }
 0x174   : > { %v3846_v16 = vpop.f32.mrf.mxu0 }
 0x175   : > { %4848 = vst [vmem:[#allocation29_spill] sm:$0xff] %v3846_v16  ;;  %v3867_v16 = vpop.f32.mrf.mxu2 }
 0x177   : > { %1234 = vmatmul.f32.gmra.mxu0 %v3604_v17 }
 0x178   : > { %v3850_v59 = vpop.f32.mrf.mxu1 }
 0x179   : > { %4849 = vst [vmem:[#allocation30_spill] sm:$0xff] %v3850_v59 }
 0x17b   : > { %1383 = vmatmul.f32.gmra.mxu1 %v3604_v17  ;;  %v3875_v17 = vpop.f32.mrf.mxu3 }
 0x17c   : > { %v3856_v45 = vpop.f32.mrf.mxu0 }
 0x17d   : > { %4850 = vst [vmem:[#allocation31_spill] sm:$0xff] %v3856_v45 }
 0x17f   : > { %1238 = vmatmul.f32.gmra.mxu0 %v3610_v25 }
 0x180   : > { %v3860_v2 = vpop.f32.mrf.mxu1 }
 0x181   : > { %4851 = vst [vmem:[#allocation32_spill] sm:$0xff] %v3860_v2  ;;  %v3878_v2 = vpop.f32.mrf.mxu2 }
 0x183   : > { %1387 = vmatmul.f32.gmra.mxu1 %v3610_v25 }
 0x184   : > { %v3862_v26 = vpop.f32.mrf.mxu0 }
 0x185   : > { %4852 = vst [vmem:[#allocation33_spill] sm:$0xff] %v3862_v26  ;;  %v3886_v26 = vpop.f32.mrf.mxu3 }
 0x187   : > { %1242 = vmatmul.f32.gmra.mxu0 %v3616_v33 }
 0x188   : > { %v3870_v59 = vpop.f32.mrf.mxu1 }
 0x189   : > { %4853 = vst [vmem:[#allocation34_spill] sm:$0xff] %v3870_v59 }
 0x18b   : > { %1391 = vmatmul.f32.gmra.mxu1 %v3616_v33 }
 0x18c   : > { %v3872_v3 = vpop.f32.mrf.mxu0 }
 0x18d   : > { %4854 = vst [vmem:[#allocation35_spill] sm:$0xff] %v3872_v3  ;;  %v3890_v3 = vpop.f32.mrf.mxu2 }
 0x18e   : > { %4858 = vst [vmem:[#allocation39_spill] sm:$0xff] %v3890_v3 }
 0x18f   : > { %1246 = vmatmul.f32.gmra.mxu0 %v3622_v40 }
 0x190   : > { %v3880_v45 = vpop.f32.mrf.mxu1 }
 0x191   : > { %4855 = vst [vmem:[#allocation36_spill] sm:$0xff] %v3880_v45  ;;  %v3898_v45 = vpop.f32.mrf.mxu3 }
 0x192   : > { %4861 = vst [vmem:[#allocation42_spill] sm:$0xff] %v3898_v45 }
 0x193   : > { %1395 = vmatmul.f32.gmra.mxu1 %v3622_v40 }
 0x194   : > { %v3882_v25 = vpop.f32.mrf.mxu0 }
 0x195   : > { %4856 = vst [vmem:[#allocation37_spill] sm:$0xff] %v3882_v25  ;;  %v3900_v25 = vpop.f32.mrf.mxu2 }
 0x196   : > { %4862 = vst [vmem:[#allocation43_spill] sm:$0xff] %v3900_v25 }
 0x197   : > { %1250 = vmatmul.f32.gmra.mxu0 %v3628_v48 }
 0x198   : > { %v3888_v59 = vpop.f32.mrf.mxu1 }
 0x199   : > { %4857 = vst [vmem:[#allocation38_spill] sm:$0xff] %v3888_v59 }
 0x19b   : > { %1399 = vmatmul.f32.gmra.mxu1 %v3628_v48  ;;  %v3911_v48 = vpop.f32.mrf.mxu3 }
 0x19c   : > { %v3892_v33 = vpop.f32.mrf.mxu0  ;;  %4866 = vst [vmem:[#allocation47_spill] sm:$0xff] %v3911_v48 }
 0x19d   : > { %4859 = vst [vmem:[#allocation40_spill] sm:$0xff] %v3892_v33  ;;  %v3913_v33 = vpop.f32.mrf.mxu2 }
 0x19e   : > { %4867 = vst [vmem:[#allocation48_spill] sm:$0xff] %v3913_v33 }
 0x19f   : > { %1254 = vmatmul.f32.gmra.mxu0 %v3634_v56 }
 0x1a0   : > { %v3896_v18 = vpop.f32.mrf.mxu1 }
 0x1a1   : > { %4860 = vst [vmem:[#allocation41_spill] sm:$0xff] %v3896_v18 }
 0x1a3   : > { %1403 = vmatmul.f32.gmra.mxu1 %v3634_v56  ;;  %v3919_v56 = vpop.f32.mrf.mxu3 }
 0x1a4   : > { %v3902_v40 = vpop.f32.mrf.mxu0  ;;  %4869 = vst [vmem:[#allocation50_spill] sm:$0xff] %v3919_v56 }
 0x1a5   : > { %4863 = vst [vmem:[#allocation44_spill] sm:$0xff] %v3902_v40 }
 0x1a7   : > { %1258 = vmatmul.f32.gmra.mxu0 %v3640_v0 }
 0x1a8   : > { %v3906_v59 = vpop.f32.mrf.mxu1 }
 0x1a9   : > { %4864 = vst [vmem:[#allocation45_spill] sm:$0xff] %v3906_v59  ;;  %v3922_v59 = vpop.f32.mrf.mxu2 }
 0x1aa   : > { %4870 = vst [vmem:[#allocation51_spill] sm:$0xff] %v3922_v59 }
 0x1ab   : > { %1407 = vmatmul.f32.gmra.mxu1 %v3640_v0  ;;  %v3926_v0 = vpop.f32.mrf.mxu3 }
 0x1ac   : > { %v3908_v46 = vpop.f32.mrf.mxu0  ;;  %4871 = vst [vmem:[#allocation52_spill] sm:$0xff] %v3926_v0 }
 0x1ad   : > { %4865 = vst [vmem:[#allocation46_spill] sm:$0xff] %v3908_v46 }
 0x1af   : > { %1262 = vmatmul.f32.gmra.mxu0 %v3646_v8 }
 0x1b0   : > { %v3916_v18 = vpop.f32.mrf.mxu1 }
 0x1b1   : > { %4868 = vst [vmem:[#allocation49_spill] sm:$0xff] %v3916_v18  ;;  %v3928_v31 = vpop.f32.mrf.mxu2 }
 0x1b2   : > { %4872 = vst [vmem:[#allocation53_spill] sm:$0xff] %v3928_v31 }
 0x1b3   : > { %1411 = vmatmul.f32.gmra.mxu1 %v3646_v8  ;;  %v202_v8 = vld [vmem:[%s4811_s2] sm:$0xff]  ;;  %v3940_v25 = vpop.f32.mrf.mxu3 }
 0x1b4   : > { %v1203_v37 = vpop.f32.mrf.mxu0  ;;  %v1480_v45 = vsel %vm236_vm0, %v202_v8, 0  ;;  %4873 = vst [vmem:[#allocation54_spill] sm:$0xff] %v3940_v25 }
 0x1b5   : > { %v3937_v56 = vand.u32 4294901760, %v1480_v45 }
 0x1b7   : > { %1266 = vmatmul.f32.gmra.mxu0 %v3652_v19 }
 0x1b8   : > { %v1352_v46 = vpop.f32.mrf.mxu1 }
 0x1b9   : > { %v3942_v33 = vpop.f32.mrf.mxu2 }
 0x1ba   : > { %4874 = vst [vmem:[#allocation55_spill] sm:$0xff] %v3942_v33 }
 0x1bb   : > { %1415 = vmatmul.f32.gmra.mxu1 %v3652_v19 }
 0x1bc   : > { %v1207_v40 = vpop.f32.mrf.mxu0 }
 0x1bd   : > { %v1208_v3 = vadd.f32 %v1207_v40, %v3682_v12 }
 0x1bf   : > { %1270 = vmatmul.f32.gmra.mxu0 %v3658_v27 }
 0x1c0   : > { %v1356_v4 = vpop.f32.mrf.mxu1 }
 0x1c1   : > { %v1357_v41 = vadd.f32 %v1356_v4, %v1208_v3  ;;  %v3977_v33 = vpop.f32.mrf.mxu2 }
 0x1c2   : > { %4876 = vst [vmem:[#allocation57_spill] sm:$0xff] %v3977_v33 }
 0x1c3   : > { %1419 = vmatmul.f32.gmra.mxu1 %v3658_v27  ;;  %v203_v27 = vld [vmem:[%s4811_s2 + $0x8] sm:$0xff]  ;;  %v3956_v4 = vand.u32 4294901760, %v1357_v41 }
 0x1c4   : > { %v1211_v18 = vpop.f32.mrf.mxu0  ;;  %v1483_v40 = vsel %vm236_vm0, %v203_v27, 0 }
 0x1c5   : > { %v1212_v19 = vadd.f32 %v1211_v18, %v3690_v34  ;;  %v1204_v34 = vadd.f32 %v1203_v37, %v3674_v57  ;;  %v3950_v18 = vsub.f32 %v1480_v45, %v3937_v56  ;;  %v3963_v45 = vand.u32 4294901760, %v1483_v40 }
 0x1c7   : > { %1274 = vmatmul.f32.gmra.mxu0 %v3664_v36  ;;  %v1353_v12 = vadd.f32 %v1352_v46, %v1204_v34  ;;  %v1547_v46 = vsub.f32 %v1357_v41, %v3956_v4  ;;  %v3982_v41 = vsub.f32 %v1483_v40, %v3963_v45 }
 0x1c8   : > { %v1360_v48 = vpop.f32.mrf.mxu1 }
 0x1c9   : > { %v1361_v0 = vadd.f32 %v1360_v48, %v1212_v19  ;;  %v3960_v48 = vand.u32 4294901760, %v3950_v18  ;;  %v3965_v19 = vand.u32 4294901760, %v1353_v12  ;;  %v3991_v63 = vand.u32 4294901760, %v3982_v41  ;;  %v4001_v31 = vpop.f32.mrf.mxu2 }
 0x1cb   : > { %1423 = vmatmul.f32.gmra.mxu1 %v3664_v36  ;;  %v3952_v8 = vand.u32 4294901760, %v1361_v0  ;;  %v1516_v39 = vsub.f32 %v3982_v41, %v3991_v63 }
 0x1cc   : > { %v1215_v59 = vpop.f32.mrf.mxu0 }
 0x1cd   : > { %v1216_v36 = vadd.f32 %v1215_v59, %v3698_v54  ;;  %v1541_v57 = vsub.f32 %v1361_v0, %v3952_v8  ;;  %v3973_v54 = vpop.f32.mrf.mxu3  ;;  %v1508_v59 = vsub.f32 %v3950_v18, %v3960_v48  ;;  %v4003_v53 = vand.u32 4294901760, %v1516_v39 }
 0x1ce   : > { %4875 = vst [vmem:[#allocation56_spill] sm:$0xff] %v3973_v54  ;;  %v1548_v54 = vand.u32 4294901760, %v1547_v46 }
 0x1cf   : > { %1278 = vmatmul.f32.gmra.mxu0 %v3670_v51  ;;  %v3987_v23 = vand.u32 4294901760, %v1508_v59 }
 0x1d0   : > { %v1364_v3 = vpop.f32.mrf.mxu1  ;;  %v1549_v60 = vsub.f32 %v1547_v46, %v1548_v54 }
 0x1d1   : > { %v1365_v37 = vadd.f32 %v1364_v3, %v1216_v36  ;;  %v1542_v36 = vand.u32 4294901760, %v1541_v57  ;;  %v1553_v3 = vsub.f32 %v1353_v12, %v3965_v19 }
 0x1d3   : > { %v3968_v34 = vand.u32 4294901760, %v1365_v37  ;;  %1427 = vmatmul.f32.gmra.mxu1 %v3670_v51  ;;  %v1543_v33 = vsub.f32 %v1541_v57, %v1542_v36  ;;  %v1554_v40 = vand.u32 4294901760, %v1553_v3 }
 0x1d4   : > { %v3970_v27 = vpop.f32.mrf.mxu0 }
 0x1d5   : > { %v1535_v0 = vsub.f32 %v1365_v37, %v3968_v34  ;;  %1498 = vmatpush.msrb.mxu2 %v3968_v34  ;;  %v1544_v59 = vand.u32 4294901760, %v1543_v33  ;;  %v3998_v25 = vpop.f32.mrf.mxu3  ;;  %v1555_v10 = vsub.f32 %v1553_v3, %v1554_v40 }
 0x1d7   : > { %1282 = vmatmul.f32.gmra.mxu0 %v3678_v6  ;;  %1500 = vmatpush.msrb.mxu2 %v3952_v8  ;;  %v1536_v51 = vand.u32 4294901760, %v1535_v0 }
 0x1d8   : > { %v1368_v15 = vpop.f32.mrf.mxu1 }
 0x1d9   : > { %1502 = vmatpush.msrb.mxu2 %v3956_v4  ;;  %v1537_v37 = vsub.f32 %v1535_v0, %v1536_v51 }
 0x1db   : > { %1431 = vmatmul.f32.gmra.mxu1 %v3678_v6  ;;  %1504 = vmatpush.msrb.mxu2 %v3965_v19  ;;  %v1538_v12 = vand.u32 4294901760, %v1537_v37  ;;  %v1550_v6 = vand.u32 4294901760, %v1549_v60 }
 0x1dc   : > { %v1223_v49 = vpop.f32.mrf.mxu0  ;;  %1510 = vmatmul.f32.vlgmr.msrb.gmra.mxu2 %v3987_v23 }
 0x1dd   : > { %1581 = vmatpush.msra.mxu2 %v1535_v0  ;;  %1539 = vmatpush.msrb.mxu3 %v1538_v12  ;;  %v1556_v0 = vand.u32 4294901760, %v1555_v10  ;;  %v4010_v60 = vpop.f32.mrf.mxu3 }
 0x1df   : > { %1286 = vmatmul.f32.gmra.mxu0 %v3686_v28  ;;  %1584 = vmatpush.msra.mxu2 %v1541_v57  ;;  %v4014_v57 = vpop.f32.mrf.mxu2 }
 0x1e0   : > { %1545 = vmatpush.msrb.mxu3 %v1544_v59  ;;  %v1372_v37 = vpop.f32.mrf.mxu1 }
 0x1e1   : > { %1587 = vmatpush.msra.mxu2 %v1547_v46 }
 0x1e2   : > { %1551 = vmatpush.msrb.mxu3 %v1550_v6 }
 0x1e3   : > { %1590 = vmatpush.msra.mxu2 %v1553_v3  ;;  %1435 = vmatmul.f32.gmra.mxu1 %v3686_v28  ;;  %v1224_v28 = vadd.f32 %v1223_v49, %v3714_v38 }
 0x1e4   : > { %v1227_v33 = vpop.f32.mrf.mxu0  ;;  %1557 = vmatpush.msrb.mxu3 %v1556_v0  ;;  %1518 = vmatmul.f32.gmra.mxu2 %v4003_v53 }
 0x1e5   : > { %1650 = vmatpush.msrb.mxu2 %v1536_v51  ;;  %1559 = vmatmul.f32.vlgmr.msrb.gmra.mxu3 %v3937_v56  ;;  %v1228_v39 = vadd.f32 %v1227_v33, %v3722_v62  ;;  %v1373_v51 = vadd.f32 %v1372_v37, %v1224_v28 }
 0x1e6   : > { %1615 = vmatpush.msra.mxu3 %v3968_v34 }
 0x1e7   : > { %1290 = vmatmul.f32.gmra.mxu0 %v3694_v47  ;;  %1654 = vmatpush.msrb.mxu2 %v1542_v36  ;;  %v1220_v36 = vadd.f32 %v3970_v27, %v3706_v13 }
 0x1e8   : > { %1617 = vmatpush.msra.mxu3 %v3952_v8  ;;  %v1376_v10 = vpop.f32.mrf.mxu1 }
 0x1e9   : > { %1658 = vmatpush.msrb.mxu2 %v1548_v54  ;;  %v1377_v46 = vadd.f32 %v1376_v10, %v1228_v39  ;;  %v1369_v62 = vadd.f32 %v1368_v15, %v1220_v36 }
 0x1ea   : > { %1619 = vmatpush.msra.mxu3 %v3956_v4 }
 0x1eb   : > { %1662 = vmatpush.msrb.mxu2 %v1554_v40  ;;  %1439 = vmatmul.f32.gmra.mxu1 %v3694_v47  ;;  %v4024_v54 = vand.u32 4294901760, %v1377_v46  ;;  %v4030_v47 = vand.u32 4294901760, %v1373_v51  ;;  %v4035_v27 = vand.u32 4294901760, %v1369_v62  ;;  %v4040_v40 = vpop.f32.mrf.mxu2 }
 0x1ec   : > { %v1231_v3 = vpop.f32.mrf.mxu0  ;;  %1621 = vmatpush.msra.mxu3 %v3965_v19  ;;  %1593 = vmatmul.f32.vlgmr.msra.gmra.mxu2 %v3950_v18 }
 0x1ed   : > { %1563 = vmatmul.f32.gmra.mxu3 %v3963_v45  ;;  %v1232_v38 = vadd.f32 %v1231_v3, %v3732_v24  ;;  %v4038_v15 = vsub.f32 %v1377_v46, %v4024_v54  ;;  %v4056_v59 = vsub.f32 %v1369_v62, %v4035_v27 }
 0x1ee   : > { %1685 = vmatpush.msrb.mxu3 %v3968_v34  ;;  %v4033_v34 = vpop.f32.mrf.mxu3 }
 0x1ef   : > { %1294 = vmatmul.f32.gmra.mxu0 %v3702_v5  ;;  %v1770_v39 = vand.u32 4294901760, %v4056_v59 }
 0x1f0   : > { %1687 = vmatpush.msrb.mxu3 %v3952_v8  ;;  %v1380_v13 = vpop.f32.mrf.mxu1  ;;  %v4049_v8 = vsub.f32 %v1373_v51, %v4030_v47 }
 0x1f1   : > { %v1381_v49 = vadd.f32 %v1380_v13, %v1232_v38 }
 0x1f2   : > { %1689 = vmatpush.msrb.mxu3 %v3956_v4  ;;  %v1764_v37 = vand.u32 4294901760, %v4049_v8 }
 0x1f3   : > { %v4042_v12 = vand.u32 4294901760, %v1381_v49  ;;  %1443 = vmatmul.f32.gmra.mxu1 %v3702_v5  ;;  %v4079_v36 = vpop.f32.mrf.mxu2 }
 0x1f4   : > { %1691 = vmatpush.msrb.mxu3 %v3965_v19  ;;  %v4045_v24 = vpop.f32.mrf.mxu0  ;;  %1598 = vmatmul.f32.gmra.mxu2 %v3982_v41  ;;  %v1758_v19 = vand.u32 4294901760, %v4038_v15  ;;  %v1765_v3 = vsub.f32 %v4049_v8, %v1764_v37 }
 0x1f5   : > { %v4052_v4 = vsub.f32 %v1381_v49, %v4042_v12  ;;  %1625 = vmatmul.f32.vlgmr.msra.gmra.mxu3 %v3960_v48  ;;  %1714 = vmatpush.msra.mxu2 %v4042_v12 }
 0x1f6   : > { %v1759_v33 = vsub.f32 %v4038_v15, %v1758_v19  ;;  %v4074_v46 = vpop.f32.mrf.mxu3  ;;  %v1766_v38 = vand.u32 4294901760, %v1765_v3  ;;  %v681_v3 = vadd.f32 %v3736_v35, %v3728_v22 }
 0x1f7   : > { %1298 = vmatmul.f32.gmra.mxu0 %v3710_v30  ;;  %v1752_v6 = vand.u32 4294901760, %v4052_v4  ;;  %1716 = vmatpush.msra.mxu2 %v4024_v54 }
 0x1f8   : > { %v4063_v5 = vpop.f32.mrf.mxu1  ;;  %v1760_v51 = vand.u32 4294901760, %v1759_v33  ;;  %v689_v33 = vadd.f32 %v3756_v7, %v3750_v58 }
 0x1f9   : > { %v1753_v0 = vsub.f32 %v4052_v4, %v1752_v6  ;;  %1718 = vmatpush.msra.mxu2 %v4030_v47 }
 0x1fb   : > { %1447 = vmatmul.f32.gmra.mxu1 %v3710_v30  ;;  %v1754_v28 = vand.u32 4294901760, %v1753_v0  ;;  %1720 = vmatpush.msra.mxu2 %v4035_v27  ;;  %v1771_v30 = vsub.f32 %v4056_v59, %v1770_v39  ;;  %v693_v0 = vadd.f32 %v3766_v32, %v3760_v20  ;;  %v685_v20 = vadd.f32 %v3746_v50, %v3740_v43 }
 0x1fc   : > { %v1239_v10 = vpop.f32.mrf.mxu0  ;;  %1664 = vmatmul.f32.vlgmr.msrb.gmra.mxu2 %v3937_v56  ;;  %v843_v43 = vadd.f32 %v3844_v52, %v681_v3 }
 0x1fd   : > { %1755 = vmatpush.msra.mxu3 %v1754_v28  ;;  %1797 = vmatpush.msrb.mxu2 %v4052_v4  ;;  %v1772_v13 = vand.u32 4294901760, %v1771_v30  ;;  %v4101_v28 = vpop.f32.mrf.mxu2  ;;  %v858_v32 = vadd.f32 %v3878_v2, %v693_v0  ;;  %v848_v7 = vadd.f32 %v3854_v11, %v685_v20 }
 0x1fe   : > { %1631 = vmatmul.f32.gmra.mxu3 %v3991_v63  ;;  %v4095_v4 = vpop.f32.mrf.mxu3  ;;  %v1033_v52 = vadd.f32 %v3852_v29, %v843_v43  ;;  %v4877_v43 = vld [vmem:[#allocation14_spill] sm:$0xff] }
 0x1ff   : > { %1302 = vmatmul.f32.gmra.mxu0 %v3718_v55  ;;  %1761 = vmatpush.msra.mxu3 %v1760_v51  ;;  %v853_v51 = vadd.f32 %v3867_v16, %v689_v33  ;;  %v1051_v30 = vadd.f32 %v3886_v26, %v858_v32  ;;  %v1039_v11 = vadd.f32 %v3865_v9, %v848_v7 }
 0x200   : > { %v1388_v62 = vpop.f32.mrf.mxu1  ;;  %1800 = vmatpush.msrb.mxu2 %v4038_v15  ;;  %v1236_v9 = vadd.f32 %v4045_v24, %v1033_v52 }
 0x201   : > { %1767 = vmatpush.msra.mxu3 %v1766_v38  ;;  %v1045_v22 = vadd.f32 %v3875_v17, %v853_v51  ;;  %v1240_v38 = vadd.f32 %v1239_v10, %v1039_v11  ;;  %v4878_v11 = vld [vmem:[#allocation53_spill] sm:$0xff] }
 0x202   : > { %1803 = vmatpush.msrb.mxu2 %v4049_v8  ;;  %v1385_v29 = vadd.f32 %v4063_v5, %v1236_v9 }
 0x203   : > { %1451 = vmatmul.f32.gmra.mxu1 %v3718_v55  ;;  %1773 = vmatpush.msra.mxu3 %v1772_v13  ;;  %v1389_v13 = vadd.f32 %v1388_v62, %v1240_v38  ;;  %v4880_v38 = vld [vmem:[#allocation7_spill] sm:$0xff] }
 0x204   : > { %v1243_v49 = vpop.f32.mrf.mxu0  ;;  %1806 = vmatpush.msrb.mxu2 %v4056_v59  ;;  %v4159_v5 = vand.u32 4294901760, %v1385_v29 }
 0x205   : > { %1668 = vmatmul.f32.gmra.mxu2 %v3963_v45  ;;  %v4125_v16 = vpop.f32.mrf.mxu2  ;;  %v1244_v26 = vadd.f32 %v1243_v49, %v1045_v22  ;;  %v4149_v24 = vand.u32 4294901760, %v1389_v13  ;;  %v713_v22 = vadd.f32 %v4877_v43, %v3796_v1  ;;  %v4887_v43 = vld [vmem:[#allocation8_spill] sm:$0xff] }
 0x206   : > { %1693 = vmatmul.f32.vlgmr.msrb.gmra.mxu3 %v3937_v56  ;;  %v4122_v50 = vpop.f32.mrf.mxu3  ;;  %v4176_v10 = vsub.f32 %v1385_v29, %v4159_v5  ;;  %v4882_v29 = vld [vmem:[#allocation12_spill] sm:$0xff] }
 0x207   : > { %1831 = vmatpush.msrb.mxu3 %v4042_v12  ;;  %1306 = vmatmul.f32.gmra.mxu0 %v3726_v21 }
 0x208   : > { %v1392_v55 = vpop.f32.mrf.mxu1 }
 0x209   : > { %1833 = vmatpush.msrb.mxu3 %v4024_v54  ;;  %v1393_v17 = vadd.f32 %v1392_v55, %v1244_v26  ;;  %v4815_v55 = vand.u32 4294901760, %v4176_v10  ;;  %v883_v26 = vadd.f32 %v4878_v11, %v713_v22  ;;  %v4888_v22 = vld [vmem:[#allocation9_spill] sm:$0xff]  ;;  %v4889_v11 = vld [vmem:[#allocation51_spill] sm:$0xff] }
 0x20b   : > { %1835 = vmatpush.msrb.mxu3 %v4030_v47  ;;  %1455 = vmatmul.f32.gmra.mxu1 %v3726_v21  ;;  %v4143_v15 = vand.u32 4294901760, %v1393_v17 }
 0x20c   : > { %v1247_v58 = vpop.f32.mrf.mxu0 }
 0x20d   : > { %1837 = vmatpush.msrb.mxu3 %v4035_v27  ;;  %1726 = vmatmul.f32.vlgmr.msra.gmra.mxu2 %v3987_v23  ;;  %v1248_v35 = vadd.f32 %v1247_v58, %v1051_v30  ;;  %v1987_v58 = vsub.f32 %v4176_v10, %v4815_v55  ;;  %v4894_v55 = vld [vmem:[#allocation43_spill] sm:$0xff] }
 0x20e   : > { %1697 = vmatmul.f32.gmra.mxu3 %v3963_v45  ;;  %1866 = vmatpush.msra.mxu2 %v1752_v6  ;;  %v4155_v59 = vpop.f32.mrf.mxu3 }
 0x20f   : > { %1310 = vmatmul.f32.gmra.mxu0 %v3738_v42 }
 0x210   : > { %v1396_v21 = vpop.f32.mrf.mxu1  ;;  %1870 = vmatpush.msra.mxu2 %v1758_v19  ;;  %v4157_v19 = vpop.f32.mrf.mxu2 }
 0x211   : > { %v1397_v2 = vadd.f32 %v1396_v21, %v1248_v35  ;;  %v1988_v21 = vand.u32 4294901760, %v1987_v58 }
 0x212   : > { %1874 = vmatpush.msra.mxu2 %v1764_v37  ;;  %v4162_v37 = vsub.f32 %v1393_v17, %v4143_v15  ;;  %v4881_v17 = vld [vmem:[#allocation54_spill] sm:$0xff] }
 0x213   : > { %1459 = vmatmul.f32.gmra.mxu1 %v3738_v42  ;;  %v4136_v0 = vand.u32 4294901760, %v1397_v2 }
 0x214   : > { %v4132_v6 = vpop.f32.mrf.mxu0  ;;  %1878 = vmatpush.msra.mxu2 %v1770_v39  ;;  %v4169_v39 = vsub.f32 %v1389_v13, %v4149_v24 }
 0x215   : > { %1734 = vmatmul.f32.gmra.mxu2 %v4003_v53  ;;  %v4152_v8 = vsub.f32 %v1397_v2, %v4136_v0 }
 0x216   : > { %1775 = vmatmul.f32.vlgmr.msra.gmra.mxu3 %v3937_v56  ;;  %v4816_v62 = vand.u32 4294901760, %v4169_v39  ;;  %v4196_v20 = vpop.f32.mrf.mxu3 }
 0x217   : > { %1901 = vmatpush.msra.mxu3 %v4042_v12  ;;  %1314 = vmatmul.f32.gmra.mxu0 %v3748_v61 }
 0x218   : > { %v4147_v42 = vpop.f32.mrf.mxu1  ;;  %v4198_v32 = vpop.f32.mrf.mxu2  ;;  %v1981_v51 = vsub.f32 %v4169_v39, %v4816_v62 }
 0x219   : > { %1903 = vmatpush.msra.mxu3 %v4024_v54  ;;  %v1968_v54 = vand.u32 4294901760, %v4152_v8 }
 0x21a   : > { %v1982_v30 = vand.u32 4294901760, %v1981_v51  ;;  %v4885_v51 = vld [vmem:[#allocation11_spill] sm:$0xff] }
 0x21b   : > { %1905 = vmatpush.msra.mxu3 %v4030_v47  ;;  %1463 = vmatmul.f32.gmra.mxu1 %v3748_v61  ;;  %v1974_v61 = vand.u32 4294901760, %v4162_v37 }
 0x21c   : > { %v4165_v12 = vpop.f32.mrf.mxu0 }
 0x21d   : > { %1907 = vmatpush.msra.mxu3 %v4035_v27  ;;  %1809 = vmatmul.f32.vlgmr.msrb.gmra.mxu2 %v3950_v18  ;;  %v1969_v27 = vsub.f32 %v4152_v8, %v1968_v54  ;;  %v1975_v33 = vsub.f32 %v4162_v37, %v1974_v61 }
 0x21e   : > { %1779 = vmatmul.f32.gmra.mxu3 %v3963_v45  ;;  %1930 = vmatpush.msrb.mxu2 %v4136_v0  ;;  %v4214_v2 = vpop.f32.mrf.mxu3 }
 0x21f   : > { %1318 = vmatmul.f32.gmra.mxu0 %v3758_v14  ;;  %v1970_v3 = vand.u32 4294901760, %v1969_v27  ;;  %v4883_v27 = vld [vmem:[#allocation13_spill] sm:$0xff] }
 0x220   : > { %v4181_v47 = vpop.f32.mrf.mxu1  ;;  %1932 = vmatpush.msrb.mxu2 %v4143_v15  ;;  %v4218_v52 = vpop.f32.mrf.mxu2 }
 0x221   : > { %4879 = vst [vmem:[#allocation14_spill] sm:$0xff] %v4218_v52 }
 0x222   : > { %1934 = vmatpush.msrb.mxu2 %v4149_v24 }
 0x223   : > { %1467 = vmatmul.f32.gmra.mxu1 %v3758_v14  ;;  %v1976_v14 = vand.u32 4294901760, %v1975_v33  ;;  %v709_v33 = vadd.f32 %v4883_v27, %v4882_v29  ;;  %v4893_v27 = vld [vmem:[#allocation48_spill] sm:$0xff] }
 0x224   : > { %v4189_v49 = vpop.f32.mrf.mxu0  ;;  %1936 = vmatpush.msrb.mxu2 %v4159_v5 }
 0x225   : > { %1814 = vmatmul.f32.gmra.mxu2 %v3982_v41 }
 0x226   : > { %1841 = vmatmul.f32.vlgmr.msrb.gmra.mxu3 %v3960_v48  ;;  %v4234_v58 = vpop.f32.mrf.mxu3 }
 0x227   : > { %1971 = vmatpush.msrb.mxu3 %v1970_v3  ;;  %1322 = vmatmul.f32.gmra.mxu0 %v3768_v44  ;;  %v4884_v3 = vld [vmem:[#allocation10_spill] sm:$0xff]  ;;  %4886 = vst [vmem:[#allocation53_spill] sm:$0xff] %v4234_v58 }
 0x228   : > { %v1408_v7 = vpop.f32.mrf.mxu1  ;;  %v4920_v58 = vld [vmem:[#allocation22_spill] sm:$0xff] }
 0x229   : > { %1977 = vmatpush.msrb.mxu3 %v1976_v14  ;;  %v705_v14 = vadd.f32 %v4885_v51, %v4884_v3 }
 0x22b   : > { %1983 = vmatpush.msrb.mxu3 %v1982_v30  ;;  %1471 = vmatmul.f32.gmra.mxu1 %v3768_v44  ;;  %v1081_v44 = vadd.f32 %v4881_v17, %v883_v26  ;;  %v878_v26 = vadd.f32 %v4889_v11, %v709_v33  ;;  %v873_v3 = vadd.f32 %v4893_v27, %v705_v14 }
 0x22c   : > { %v1263_v35 = vpop.f32.mrf.mxu0 }
 0x22d   : > { %1989 = vmatpush.msrb.mxu3 %v1988_v21  ;;  %1880 = vmatmul.f32.vlgmr.msra.gmra.mxu2 %v3937_v56  ;;  %v701_v21 = vadd.f32 %v4888_v22, %v4887_v43  ;;  %v4895_v43 = vld [vmem:[#allocation52_spill] sm:$0xff] }
 0x22e   : > { %1847 = vmatmul.f32.gmra.mxu3 %v3991_v63  ;;  %2013 = vmatpush.msra.mxu2 %v4152_v8  ;;  %v1075_v22 = vadd.f32 %v4895_v43, %v878_v26  ;;  %v4265_v27 = vpop.f32.mrf.mxu3  ;;  %v4900_v43 = vld [vmem:[#allocation42_spill] sm:$0xff] }
 0x22f   : > { %1326 = vmatmul.f32.gmra.mxu0 %v4880_v38  ;;  %v868_v62 = vadd.f32 %v4894_v55, %v701_v21  ;;  %4899 = vst [vmem:[#allocation54_spill] sm:$0xff] %v4265_v27 }
 0x230   : > { %v1412_v1 = vpop.f32.mrf.mxu1  ;;  %2016 = vmatpush.msra.mxu2 %v4162_v37 }
 0x232   : > { %2019 = vmatpush.msra.mxu2 %v4169_v39 }
 0x233   : > { %1475 = vmatmul.f32.gmra.mxu1 %v4880_v38  ;;  %v4239_v38 = vpop.f32.mrf.mxu2 }
 0x234   : > { %v1267_v9 = vpop.f32.mrf.mxu0  ;;  %2022 = vmatpush.msra.mxu2 %v4176_v10  ;;  %4890 = vst [vmem:[#allocation7_spill] sm:$0xff] %v4239_v38 }
 0x235   : > { %v1268_v13 = vadd.f32 %v1267_v9, %v1081_v44  ;;  %1884 = vmatmul.f32.gmra.mxu2 %v3963_v45  ;;  %v4891_v44 = vld [vmem:[#allocation5_spill] sm:$0xff]  ;;  %v4892_v9 = vld [vmem:[#allocation6_spill] sm:$0xff] }
 0x236   : > { %1909 = vmatmul.f32.vlgmr.msra.gmra.mxu3 %v3937_v56  ;;  %v697_v29 = vadd.f32 %v4892_v9, %v4891_v44  ;;  %v1264_v44 = vadd.f32 %v1263_v35, %v1075_v22  ;;  %v4898_v9 = vld [vmem:[#allocation47_spill] sm:$0xff]  ;;  %v4303_v22 = vpop.f32.mrf.mxu3 }
 0x237   : > { %2047 = vmatpush.msra.mxu3 %v4136_v0  ;;  %v1063_v55 = vadd.f32 %v4898_v9, %v868_v62  ;;  %4904 = vst [vmem:[#allocation13_spill] sm:$0xff] %v4303_v22  ;;  %v4915_v22 = vld [vmem:[#allocation27_spill] sm:$0xff] }
 0x238   : > { %v1416_v30 = vpop.f32.mrf.mxu1  ;;  %v1413_v26 = vadd.f32 %v1412_v1, %v1264_v44 }
 0x239   : > { %2049 = vmatpush.msra.mxu3 %v4143_v15  ;;  %v4242_v17 = vadd.f32 %v1416_v30, %v1268_v13  ;;  %v4896_v13 = vld [vmem:[#allocation39_spill] sm:$0xff]  ;;  %v4897_v30 = vld [vmem:[#allocation50_spill] sm:$0xff]  ;;  %v1256_v35 = vadd.f32 %v4165_v12, %v1063_v55 }
 0x23a   : > { %v863_v33 = vadd.f32 %v4896_v13, %v697_v29  ;;  %v1069_v11 = vadd.f32 %v4897_v30, %v873_v3  ;;  %v4277_v37 = vand.u32 4294901760, %v1413_v26 }
 0x23b   : > { %2051 = vmatpush.msra.mxu3 %v4149_v24  ;;  %v4268_v13 = vpop.f32.mrf.mxu2 }
 0x23c   : > { %v4248_v51 = vpop.f32.mrf.mxu0  ;;  %v1260_v21 = vadd.f32 %v4189_v49, %v1069_v11  ;;  %v1057_v29 = vadd.f32 %v4900_v43, %v863_v33  ;;  %4901 = vst [vmem:[#allocation12_spill] sm:$0xff] %v4268_v13  ;;  %v1405_v49 = vadd.f32 %v4181_v47, %v1256_v35  ;;  %v4292_v47 = vsub.f32 %v1413_v26, %v4277_v37 }
 0x23d   : > { %2053 = vmatpush.msra.mxu3 %v4159_v5  ;;  %1942 = vmatmul.f32.vlgmr.msrb.gmra.mxu2 %v3987_v23 }
 0x23e   : > { %1913 = vmatmul.f32.gmra.mxu3 %v3963_v45  ;;  %2082 = vmatpush.msrb.mxu2 %v1968_v54  ;;  %v1409_v8 = vadd.f32 %v1408_v7, %v1260_v21  ;;  %v4902_v54 = vand.u32 4294901760, %v4169_v39  ;;  %v1252_v62 = vadd.f32 %v4132_v6, %v1057_v29  ;;  %v4289_v6 = vand.u32 4294901760, %v1405_v49  ;;  %v4339_v29 = vpop.f32.mrf.mxu3 }
 0x23f   : > { %v4820_v30 = vand.u32 4294901760, %v4292_v47  ;;  %4906 = vst [vmem:[#allocation11_spill] sm:$0xff] %v4339_v29  ;;  %v4916_v29 = vld [vmem:[#allocation28_spill] sm:$0xff] }
 0x240   : > { %v4259_v14 = vpop.f32.mrf.mxu1  ;;  %2086 = vmatpush.msrb.mxu2 %v1974_v61  ;;  %v4903_v61 = vand.u32 4294901760, %v4176_v10  ;;  %v1401_v12 = vadd.f32 %v4147_v42, %v1252_v62  ;;  %v4284_v7 = vand.u32 4294901760, %v1409_v8  ;;  %v4308_v33 = vsub.f32 %v1405_v49, %v4289_v6 }
 0x241   : > { %v2185_v44 = vsub.f32 %v4292_v47, %v4820_v30  ;;  %v4914_v30 = vld [vmem:[#allocation24_spill] sm:$0xff]  ;;  %v741_v38 = vadd.f32 %v4916_v29, %v4915_v22 }
 0x242   : > { %2090 = vmatpush.msrb.mxu2 %v4902_v54  ;;  %v4295_v10 = vand.u32 4294901760, %v1401_v12  ;;  %v4298_v1 = vsub.f32 %v1409_v8, %v4284_v7 }
 0x243   : > { %v2186_v26 = vand.u32 4294901760, %v2185_v44 }
 0x244   : > { %v4273_v3 = vpop.f32.mrf.mxu0  ;;  %2094 = vmatpush.msrb.mxu2 %v4903_v61 }
 0x245   : > { %1950 = vmatmul.f32.gmra.mxu2 %v4003_v53 }
 0x246   : > { %1991 = vmatmul.f32.vlgmr.msrb.gmra.mxu3 %v3937_v56 }
 0x247   : > { %2117 = vmatpush.msrb.mxu3 %v4136_v0  ;;  %v4305_v0 = vpop.f32.mrf.mxu2 }
 0x248   : > { %v4287_v39 = vpop.f32.mrf.mxu1  ;;  %4905 = vst [vmem:[#allocation10_spill] sm:$0xff] %v4305_v0  ;;  %v4919_v0 = vld [vmem:[#allocation21_spill] sm:$0xff] }
 0x249   : > { %2119 = vmatpush.msrb.mxu3 %v4143_v15  ;;  %v4315_v15 = vsub.f32 %v1401_v12, %v4295_v10 }
 0x24b   : > { %2121 = vmatpush.msrb.mxu3 %v4149_v24  ;;  %v4819_v24 = vand.u32 4294901760, %v4298_v1  ;;  %v4817_v21 = vand.u32 4294901760, %v4315_v15 }
 0x24c   : > { %v4301_v42 = vpop.f32.mrf.mxu0 }
 0x24d   : > { %2123 = vmatpush.msrb.mxu3 %v4159_v5  ;;  %2025 = vmatmul.f32.vlgmr.msra.gmra.mxu2 %v3950_v18  ;;  %v4818_v5 = vand.u32 4294901760, %v4308_v33  ;;  %v2191_v55 = vsub.f32 %v4298_v1, %v4819_v24  ;;  %v2203_v54 = vsub.f32 %v4315_v15, %v4817_v21  ;;  %v4909_v21 = vld [vmem:[#allocation25_spill] sm:$0xff]  ;;  %v4913_v24 = vld [vmem:[#allocation23_spill] sm:$0xff] }
 0x24e   : > { %1995 = vmatmul.f32.gmra.mxu3 %v3963_v45  ;;  %2146 = vmatpush.msra.mxu2 %v4277_v37  ;;  %v733_v27 = vadd.f32 %v4914_v30, %v4913_v24  ;;  %v4921_v30 = vld [vmem:[#allocation15_spill] sm:$0xff]  ;;  %v4922_v24 = vld [vmem:[#allocation16_spill] sm:$0xff] }
 0x24f   : > { %v2197_v43 = vsub.f32 %v4308_v33, %v4818_v5  ;;  %v4341_v35 = vpop.f32.mrf.mxu2  ;;  %v2192_v8 = vand.u32 4294901760, %v2191_v55  ;;  %v2204_v12 = vand.u32 4294901760, %v2203_v54 }
 0x250   : > { %v4319_v11 = vpop.f32.mrf.mxu1  ;;  %2148 = vmatpush.msra.mxu2 %v4284_v7  ;;  %4907 = vst [vmem:[#allocation8_spill] sm:$0xff] %v4341_v35  ;;  %v4918_v35 = vld [vmem:[#allocation18_spill] sm:$0xff] }
 0x251   : > { %v2198_v49 = vand.u32 4294901760, %v2197_v43 }
 0x252   : > { %2150 = vmatpush.msra.mxu2 %v4289_v6 }
 0x254   : > { %v4327_v9 = vpop.f32.mrf.mxu0  ;;  %2152 = vmatpush.msra.mxu2 %v4295_v10 }
 0x255   : > { %2030 = vmatmul.f32.gmra.mxu2 %v3982_v41 }
 0x256   : > { %2057 = vmatmul.f32.vlgmr.msra.gmra.mxu3 %v3960_v48 }
 0x257   : > { %2187 = vmatpush.msra.mxu3 %v2186_v26  ;;  %v4353_v26 = vpop.f32.mrf.mxu3 }
 0x258   : > { %v4346_v62 = vpop.f32.mrf.mxu1  ;;  %4908 = vst [vmem:[#allocation9_spill] sm:$0xff] %v4353_v26  ;;  %v4917_v26 = vld [vmem:[#allocation17_spill] sm:$0xff] }
 0x259   : > { %2193 = vmatpush.msra.mxu3 %v2192_v8  ;;  %v4910_v8 = vld [vmem:[#allocation26_spill] sm:$0xff]  ;;  %v721_v13 = vadd.f32 %v4918_v35, %v4917_v26  ;;  %v908_v35 = vadd.f32 %v4040_v40, %v733_v27  ;;  %v4924_v26 = vld [vmem:[#allocation57_spill] sm:$0xff] }
 0x25a   : > { %v737_v43 = vadd.f32 %v4910_v8, %v4909_v21  ;;  %v729_v21 = vadd.f32 %v4920_v58, %v4919_v0  ;;  %v918_v58 = vadd.f32 %v4101_v28, %v741_v38 }
 0x25b   : > { %2199 = vmatpush.msra.mxu3 %v2198_v49  ;;  %v4911_v49 = vld [vmem:[#allocation19_spill] sm:$0xff]  ;;  %v1111_v40 = vadd.f32 %v4074_v46, %v908_v35  ;;  %v4926_v46 = vand.u32 4294901760, %v4292_v47 }
 0x25c   : > { %v1287_v61 = vpop.f32.mrf.mxu0  ;;  %v913_v8 = vadd.f32 %v4079_v36, %v737_v43  ;;  %v893_v36 = vadd.f32 %v4924_v26, %v721_v13  ;;  %v903_v43 = vadd.f32 %v4014_v57, %v729_v21  ;;  %v1123_v28 = vadd.f32 %v4122_v50, %v918_v58  ;;  %v4927_v50 = vld [vmem:[#allocation56_spill] sm:$0xff] }
 0x25d   : > { %2205 = vmatpush.msra.mxu3 %v2204_v12  ;;  %2096 = vmatmul.f32.vlgmr.msrb.gmra.mxu2 %v3937_v56  ;;  %v4912_v12 = vld [vmem:[#allocation20_spill] sm:$0xff]  ;;  %v1288_v13 = vadd.f32 %v1287_v61, %v1111_v40 }
 0x25e   : > { %2063 = vmatmul.f32.gmra.mxu3 %v3991_v63  ;;  %2229 = vmatpush.msrb.mxu2 %v4292_v47  ;;  %v725_v5 = vadd.f32 %v4912_v12, %v4911_v49  ;;  %v717_v49 = vadd.f32 %v4922_v24, %v4921_v30  ;;  %v1117_v52 = vadd.f32 %v4095_v4, %v913_v8  ;;  %v4925_v24 = vld [vmem:[#allocation55_spill] sm:$0xff] }
 0x25f   : > { %v4351_v44 = vpop.f32.mrf.mxu2  ;;  %v1093_v27 = vadd.f32 %v3998_v25, %v893_v36  ;;  %v1105_v57 = vadd.f32 %v4033_v34, %v903_v43 }
 0x260   : > { %v1436_v55 = vpop.f32.mrf.mxu1  ;;  %2232 = vmatpush.msrb.mxu2 %v4298_v1  ;;  %v898_v12 = vadd.f32 %v4001_v31, %v725_v5 }
 0x261   : > { %v1284_v8 = vadd.f32 %v4327_v9, %v1105_v57  ;;  %v4932_v57 = vld [vmem:[#allocation34_spill] sm:$0xff] }
 0x262   : > { %2235 = vmatpush.msrb.mxu2 %v4308_v33  ;;  %v1099_v31 = vadd.f32 %v4010_v60, %v898_v12 }
 0x264   : > { %v1291_v54 = vpop.f32.mrf.mxu0  ;;  %2238 = vmatpush.msrb.mxu2 %v4315_v15  ;;  %v1280_v4 = vadd.f32 %v4301_v42, %v1099_v31  ;;  %v4928_v42 = vand.u32 4294901760, %v4298_v1 }
 0x265   : > { %2100 = vmatmul.f32.gmra.mxu2 %v3963_v45  ;;  %v1292_v38 = vadd.f32 %v1291_v54, %v1117_v52  ;;  %v1276_v54 = vadd.f32 %v4273_v3, %v1093_v27  ;;  %v1433_v3 = vadd.f32 %v4346_v62, %v1284_v8  ;;  %v4931_v27 = vld [vmem:[#allocation33_spill] sm:$0xff] }
 0x266   : > { %2125 = vmatmul.f32.vlgmr.msrb.gmra.mxu3 %v3937_v56  ;;  %v1429_v34 = vadd.f32 %v4319_v11, %v1280_v4  ;;  %v4929_v11 = vand.u32 4294901760, %v4308_v33  ;;  %v753_v4 = vadd.f32 %v4932_v57, %v4931_v27 }
 0x267   : > { %2263 = vmatpush.msrb.mxu3 %v4277_v37  ;;  %v4376_v29 = vpop.f32.mrf.mxu2  ;;  %v4436_v62 = vand.u32 4294901760, %v1433_v3 }
 0x268   : > { %v1440_v22 = vpop.f32.mrf.mxu1  ;;  %4923 = vst [vmem:[#allocation51_spill] sm:$0xff] %v4376_v29  ;;  %v4382_v0 = vpop.f32.mrf.mxu3  ;;  %v888_v29 = vadd.f32 %v4925_v24, %v717_v49  ;;  %v1437_v49 = vadd.f32 %v1436_v55, %v1288_v13  ;;  %v4422_v55 = vand.u32 4294901760, %v1429_v34  ;;  %v4460_v24 = vand.u32 4294901760, %v4242_v17 }
 0x269   : > { %2265 = vmatpush.msrb.mxu3 %v4284_v7  ;;  %v1441_v5 = vadd.f32 %v1440_v22, %v1292_v38  ;;  %v4466_v40 = vsub.f32 %v1433_v3, %v4436_v62 }
 0x26a   : > { %v1087_v52 = vadd.f32 %v4927_v50, %v888_v29  ;;  %v1425_v29 = vadd.f32 %v4287_v39, %v1276_v54  ;;  %v4424_v58 = vand.u32 4294901760, %v1437_v49  ;;  %v4930_v39 = vand.u32 4294901760, %v4315_v15  ;;  %v4935_v50 = vld [vmem:[#allocation29_spill] sm:$0xff] }
 0x26b   : > { %2267 = vmatpush.msrb.mxu3 %v4289_v6  ;;  %v4413_v12 = vand.u32 4294901760, %v1441_v5  ;;  %v4451_v43 = vsub.f32 %v1429_v34, %v4422_v55 }
 0x26c   : > { %v1295_v30 = vpop.f32.mrf.mxu0  ;;  %v1272_v47 = vadd.f32 %v4248_v51, %v1087_v52  ;;  %v4434_v33 = vand.u32 4294901760, %v1425_v29  ;;  %v4936_v52 = vld [vmem:[#allocation30_spill] sm:$0xff] }
 0x26d   : > { %2269 = vmatpush.msrb.mxu3 %v4295_v10  ;;  %2158 = vmatmul.f32.vlgmr.msra.gmra.mxu2 %v3987_v23  ;;  %v1296_v60 = vadd.f32 %v1295_v30, %v1123_v28  ;;  %v4454_v30 = vsub.f32 %v1437_v49, %v4424_v58  ;;  %v2400_v38 = vand.u32 4294901760, %v4451_v43  ;;  %v745_v54 = vadd.f32 %v4936_v52, %v4935_v50  ;;  %v4939_v50 = vld [vmem:[#allocation14_spill] sm:$0xff] }
 0x26e   : > { %2129 = vmatmul.f32.gmra.mxu3 %v3963_v45  ;;  %2298 = vmatpush.msra.mxu2 %v4926_v46  ;;  %v1421_v1 = vadd.f32 %v4259_v14, %v1272_v47  ;;  %v4439_v14 = vsub.f32 %v1441_v5, %v4413_v12  ;;  %v4463_v31 = vsub.f32 %v1425_v29, %v4434_v33  ;;  %v4934_v5 = vld [vmem:[#allocation32_spill] sm:$0xff] }
 0x26f   : > { %v4402_v25 = vpop.f32.mrf.mxu2  ;;  %v933_v49 = vadd.f32 %v4198_v32, %v753_v4 }
 0x270   : > { %v1444_v21 = vpop.f32.mrf.mxu1  ;;  %2302 = vmatpush.msra.mxu2 %v4928_v42  ;;  %v4408_v22 = vpop.f32.mrf.mxu3  ;;  %v4448_v36 = vand.u32 4294901760, %v1421_v1  ;;  %v2406_v13 = vand.u32 4294901760, %v4463_v31  ;;  %v1561_v42 = vadd.f32 %v4382_v0, %v4351_v44  ;;  %v4937_v44 = vld [vmem:[#allocation35_spill] sm:$0xff]  ;;  %v4938_v0 = vld [vmem:[#allocation36_spill] sm:$0xff] }
 0x271   : > { %v1445_v61 = vadd.f32 %v1444_v21, %v1296_v60  ;;  %v1141_v57 = vadd.f32 %v4214_v2, %v933_v49 }
 0x272   : > { %2306 = vmatpush.msra.mxu2 %v4929_v11  ;;  %v4474_v28 = vsub.f32 %v1421_v1, %v4448_v36  ;;  %v1595_v32 = vadd.f32 %v4402_v25, %v1561_v42  ;;  %v923_v11 = vadd.f32 %v4125_v16, %v745_v54  ;;  %v757_v1 = vadd.f32 %v4938_v0, %v4937_v44  ;;  %v4940_v42 = vld [vmem:[#allocation51_spill] sm:$0xff]  ;;  %v4941_v44 = vld [vmem:[#allocation53_spill] sm:$0xff] }
 0x273   : > { %v4415_v35 = vand.u32 4294901760, %v1445_v61 }
 0x274   : > { %v4419_v9 = vpop.f32.mrf.mxu0  ;;  %2310 = vmatpush.msra.mxu2 %v4930_v39  ;;  %v2412_v21 = vand.u32 4294901760, %v4474_v28 }
 0x275   : > { %v4427_v51 = vsub.f32 %v1445_v61, %v4415_v35  ;;  %2695 = vmatpush.msra.mxu1 %v4415_v35  ;;  %2166 = vmatmul.f32.gmra.mxu2 %v4003_v53  ;;  %v2407_v61 = vsub.f32 %v4463_v31, %v2406_v13 }
 0x276   : > { %2207 = vmatmul.f32.vlgmr.msra.gmra.mxu3 %v3937_v56  ;;  %v2413_v27 = vsub.f32 %v4474_v28, %v2412_v21 }
 0x277   : > { %2333 = vmatpush.msra.mxu3 %v4277_v37  ;;  %2661 = vmatpush.msra.mxu0 %v4427_v51  ;;  %v4446_v26 = vpop.f32.mrf.mxu2  ;;  %v2408_v16 = vand.u32 4294901760, %v2407_v61 }
 0x278   : > { %2697 = vmatpush.msra.mxu1 %v4413_v12  ;;  %v4444_v15 = vpop.f32.mrf.mxu1  ;;  %v1626_v37 = vpop.f32.mrf.mxu3  ;;  %v2414_v52 = vand.u32 4294901760, %v2413_v27 }
 0x279   : > { %2335 = vmatpush.msra.mxu3 %v4284_v7  ;;  %2664 = vmatpush.msra.mxu0 %v4439_v14 }
 0x27a   : > { %2699 = vmatpush.msra.mxu1 %v4424_v58 }
 0x27b   : > { %2337 = vmatpush.msra.mxu3 %v4289_v6  ;;  %2667 = vmatpush.msra.mxu0 %v4454_v30  ;;  %v4485_v6 = vsub.f32 %v4242_v17, %v4460_v24  ;;  %v2401_v17 = vsub.f32 %v4451_v43, %v2400_v38 }
 0x27c   : > { %v1303_v7 = vpop.f32.mrf.mxu0  ;;  %2701 = vmatpush.msra.mxu1 %v4436_v62 }
 0x27d   : > { %2339 = vmatpush.msra.mxu3 %v4295_v10  ;;  %2670 = vmatpush.msra.mxu0 %v4466_v40  ;;  %v4933_v10 = vld [vmem:[#allocation31_spill] sm:$0xff]  ;;  %v2418_v47 = vand.u32 4294901760, %v4485_v6  ;;  %v2402_v39 = vand.u32 4294901760, %v2401_v17 }
 0x27e   : > { %2211 = vmatmul.f32.gmra.mxu3 %v3963_v45  ;;  %2241 = vmatmul.f32.vlgmr.msrb.gmra.mxu2 %v3950_v18  ;;  %v749_v60 = vadd.f32 %v4934_v5, %v4933_v10 }
 0x27f   : > { %2362 = vmatpush.msrb.mxu2 %v4422_v55  ;;  %2673 = vmatmul.f32.vlgmr.msra.gmra.mxu0 %v3950_v18  ;;  %v1665_v8 = vpop.f32.mrf.mxu2  ;;  %v2419_v25 = vsub.f32 %v4485_v6, %v2418_v47 }
 0x280   : > { %v1452_v46 = vpop.f32.mrf.mxu1  ;;  %2705 = vmatmul.f32.vlgmr.msra.gmra.mxu1 %v3960_v48  ;;  %v928_v29 = vadd.f32 %v4157_v19, %v749_v60  ;;  %v1627_v19 = vadd.f32 %v1626_v37, %v1595_v32  ;;  %v1129_v60 = vadd.f32 %v4155_v59, %v923_v11  ;;  %v938_v37 = vadd.f32 %v4939_v50, %v757_v1 }
 0x281   : > { %2364 = vmatpush.msrb.mxu2 %v4434_v33  ;;  %v1632_v34 = vpop.f32.mrf.mxu3  ;;  %v2420_v59 = vand.u32 4294901760, %v2419_v25 }
 0x282   : > { %v1135_v4 = vadd.f32 %v4196_v20, %v928_v29  ;;  %v1666_v2 = vadd.f32 %v1665_v8, %v1627_v19  ;;  %v1565_v8 = vadd.f32 %v4408_v22, %v4940_v42  ;;  %v1300_v29 = vadd.f32 %v4419_v9, %v1129_v60 }
 0x283   : > { %2366 = vmatpush.msrb.mxu2 %v4448_v36  ;;  %v1147_v0 = vadd.f32 %v4941_v44, %v938_v37 }
 0x284   : > { %v1307_v3 = vpop.f32.mrf.mxu0  ;;  %v1304_v20 = vadd.f32 %v1303_v7, %v1135_v4  ;;  %v1600_v11 = vadd.f32 %v4446_v26, %v1565_v8  ;;  %v1449_v7 = vadd.f32 %v4444_v15, %v1300_v29 }
 0x285   : > { %2368 = vmatpush.msrb.mxu2 %v4460_v24  ;;  %v1308_v10 = vadd.f32 %v1307_v3, %v1141_v57 }
 0x286   : > { %2246 = vmatmul.f32.gmra.mxu2 %v3982_v41  ;;  %2273 = vmatmul.f32.vlgmr.msrb.gmra.mxu3 %v3960_v48  ;;  %v1453_v3 = vadd.f32 %v1452_v46, %v1304_v20  ;;  %v1633_v22 = vadd.f32 %v1632_v34, %v1600_v11  ;;  %v4555_v19 = vand.u32 4294901760, %v1449_v7 }
 0x287   : > { %2403 = vmatpush.msrb.mxu3 %v2402_v39  ;;  %2678 = vmatmul.f32.gmra.mxu0 %v3982_v41 }
 0x288   : > { %v1456_v5 = vpop.f32.mrf.mxu1  ;;  %2711 = vmatmul.f32.gmra.mxu1 %v3991_v63  ;;  %v1669_v54 = vpop.f32.mrf.mxu2  ;;  %v4550_v9 = vand.u32 4294901760, %v1453_v3 }
 0x289   : > { %2409 = vmatpush.msrb.mxu3 %v2408_v16  ;;  %v1694_v17 = vpop.f32.mrf.mxu3  ;;  %v1457_v49 = vadd.f32 %v1456_v5, %v1308_v10  ;;  %v1670_v46 = vadd.f32 %v1669_v54, %v1633_v22  ;;  %v4942_v22 = vld [vmem:[#allocation44_spill] sm:$0xff] }
 0x28a   : > { %v1695_v61 = vadd.f32 %v1694_v17, %v1666_v2  ;;  %v4564_v4 = vsub.f32 %v1453_v3, %v4550_v9  ;;  %v4576_v2 = vsub.f32 %v1449_v7, %v4555_v19 }
 0x28b   : > { %2415 = vmatpush.msrb.mxu3 %v2414_v52  ;;  %v4545_v1 = vand.u32 4294901760, %v1457_v49 }
 0x28c   : > { %v1311_v32 = vpop.f32.mrf.mxu0  ;;  %3214 = vst.msk [vmem:[%s4535_s18] sm:$0xff] %vm3213_vm1, %v1695_v61  ;;  %v2844_v52 = vand.u32 4294901760, %v4564_v4  ;;  %v2850_v42 = vand.u32 4294901760, %v4576_v2 }
 0x28d   : > { %2421 = vmatpush.msrb.mxu3 %v2420_v59  ;;  %v1312_v39 = vadd.f32 %v1311_v32, %v1147_v0  ;;  %v4558_v16 = vsub.f32 %v1457_v49, %v4545_v1 }
 0x28e   : > { %2279 = vmatmul.f32.gmra.mxu3 %v3991_v63  ;;  %2312 = vmatmul.f32.vlgmr.msra.gmra.mxu2 %v3937_v56  ;;  %v2845_v59 = vsub.f32 %v4564_v4, %v2844_v52  ;;  %v2851_v3 = vsub.f32 %v4576_v2, %v2850_v42 }
 0x28f   : > { %2445 = vmatpush.msra.mxu2 %v4451_v43  ;;  %v2838_v60 = vand.u32 4294901760, %v4558_v16 }
 0x290   : > { %v1460_v26 = vpop.f32.mrf.mxu1  ;;  %v4553_v15 = vpop.f32.mrf.mxu2  ;;  %v2846_v11 = vand.u32 4294901760, %v2845_v59  ;;  %v2852_v7 = vand.u32 4294901760, %v2851_v3  ;;  %v4953_v59 = vld [vmem:[#allocation7_spill] sm:$0xff] }
 0x291   : > { %2448 = vmatpush.msra.mxu2 %v4463_v31  ;;  %v1461_v27 = vadd.f32 %v1460_v26, %v1312_v39  ;;  %v1698_v57 = vpop.f32.mrf.mxu3  ;;  %v2839_v49 = vsub.f32 %v4558_v16, %v2838_v60  ;;  %v4943_v39 = vld [vmem:[#allocation45_spill] sm:$0xff]  ;;  %v4944_v26 = vld [vmem:[#allocation40_spill] sm:$0xff] }
 0x292   : > { %v1699_v34 = vadd.f32 %v1698_v57, %v1670_v46  ;;  %v769_v43 = vadd.f32 %v4943_v39, %v4942_v22  ;;  %v4945_v46 = vld [vmem:[#allocation41_spill] sm:$0xff] }
 0x293   : > { %v4560_v25 = vand.u32 4294901760, %v1461_v27  ;;  %2451 = vmatpush.msra.mxu2 %v4474_v28  ;;  %v2840_v29 = vand.u32 4294901760, %v2839_v49  ;;  %v765_v31 = vadd.f32 %v4945_v46, %v4944_v26  ;;  %v4950_v28 = vld [vmem:[#allocation10_spill] sm:$0xff]  ;;  %v4956_v39 = vld [vmem:[#allocation9_spill] sm:$0xff] }
 0x294   : > { %v4566_v10 = vpop.f32.mrf.mxu0  ;;  %3215 = vst.msk [vmem:[%s4535_s18 + $0x8] sm:$0xff] %vm3213_vm1, %v1699_v34  ;;  %v4948_v34 = vld [vmem:[#allocation37_spill] sm:$0xff]  ;;  %v4957_v46 = vld [vmem:[#allocation54_spill] sm:$0xff] }
 0x295   : > { %v4571_v5 = vsub.f32 %v1461_v27, %v4560_v25  ;;  %2454 = vmatpush.msra.mxu2 %v4485_v6  ;;  %2794 = vmatpush.msrb.mxu0 %v4560_v25  ;;  %v4947_v27 = vld [vmem:[#allocation49_spill] sm:$0xff]  ;;  %v4951_v6 = vld [vmem:[#allocation12_spill] sm:$0xff] }
 0x296   : > { %2316 = vmatmul.f32.gmra.mxu2 %v3963_v45  ;;  %2341 = vmatmul.f32.vlgmr.msra.gmra.mxu3 %v3937_v56 }
 0x297   : > { %v2832_v50 = vand.u32 4294901760, %v4571_v5  ;;  %2479 = vmatpush.msra.mxu3 %v4422_v55  ;;  %2796 = vmatpush.msrb.mxu0 %v4545_v1 }
 0x298   : > { %v4584_v37 = vpop.f32.mrf.mxu1  ;;  %v4590_v17 = vpop.f32.mrf.mxu2 }
 0x299   : > { %v2833_v54 = vsub.f32 %v4571_v5, %v2832_v50  ;;  %2481 = vmatpush.msra.mxu3 %v4434_v33  ;;  %2798 = vmatpush.msrb.mxu0 %v4550_v9  ;;  %v4592_v20 = vpop.f32.mrf.mxu3 }
 0x29b   : > { %2483 = vmatpush.msra.mxu3 %v4448_v36  ;;  %2800 = vmatpush.msrb.mxu0 %v4555_v19  ;;  %v2834_v8 = vand.u32 4294901760, %v2833_v54  ;;  %v4952_v54 = vld [vmem:[#allocation8_spill] sm:$0xff] }
 0x29c   : > { %v1319_v61 = vpop.f32.mrf.mxu0  ;;  %2806 = vmatmul.f32.vlgmr.msrb.gmra.mxu0 %v3987_v23 }
 0x29d   : > { %2946 = vmatpush.msra.mxu0 %v2832_v50  ;;  %2485 = vmatpush.msra.mxu3 %v4460_v24 }
 0x29e   : > { %2835 = vmatpush.msrb.mxu1 %v2834_v8  ;;  %2345 = vmatmul.f32.gmra.mxu3 %v3963_v45 }
 0x29f   : > { %2374 = vmatmul.f32.vlgmr.msrb.gmra.mxu2 %v3987_v23  ;;  %2950 = vmatpush.msra.mxu0 %v2838_v60  ;;  %v4949_v60 = vld [vmem:[#allocation38_spill] sm:$0xff] }
 0x2a0   : > { %2514 = vmatpush.msrb.mxu2 %v2400_v38  ;;  %2841 = vmatpush.msrb.mxu1 %v2840_v29  ;;  %v1468_v32 = vpop.f32.mrf.mxu1  ;;  %v4610_v0 = vpop.f32.mrf.mxu2  ;;  %v761_v50 = vadd.f32 %v4949_v60, %v4948_v34  ;;  %v4954_v29 = vld [vmem:[#allocation11_spill] sm:$0xff]  ;;  %v2628_v60 = vand.u32 4294901760, %v4454_v30 }
 0x2a1   : > { %2954 = vmatpush.msra.mxu0 %v2844_v52  ;;  %v4608_v44 = vpop.f32.mrf.mxu3 }
 0x2a2   : > { %2518 = vmatpush.msrb.mxu2 %v2406_v13  ;;  %2847 = vmatpush.msrb.mxu1 %v2846_v11  ;;  %v4946_v13 = vld [vmem:[#allocation46_spill] sm:$0xff] }
 0x2a3   : > { %2958 = vmatpush.msra.mxu0 %v2850_v42  ;;  %v773_v57 = vadd.f32 %v4947_v27, %v4946_v13 }
 0x2a4   : > { %2522 = vmatpush.msrb.mxu2 %v2412_v21  ;;  %v1323_v38 = vpop.f32.mrf.mxu0  ;;  %2853 = vmatpush.msrb.mxu1 %v2852_v7  ;;  %v953_v21 = vadd.f32 %v4950_v28, %v769_v43  ;;  %v4955_v7 = vld [vmem:[#allocation13_spill] sm:$0xff] }
 0x2a5   : > { %2855 = vmatmul.f32.vlgmr.msrb.gmra.mxu1 %v3937_v56  ;;  %2814 = vmatmul.f32.gmra.mxu0 %v4003_v53  ;;  %v958_v49 = vadd.f32 %v4952_v54, %v773_v57  ;;  %v2622_v57 = vand.u32 4294901760, %v4439_v14 }
 0x2a6   : > { %2526 = vmatpush.msrb.mxu2 %v2418_v47  ;;  %2981 = vmatpush.msra.mxu1 %v4560_v25  ;;  %v948_v47 = vadd.f32 %v4951_v6, %v765_v31  ;;  %v1165_v3 = vadd.f32 %v4954_v29, %v953_v21  ;;  %v1777_v6 = vadd.f32 %v4592_v20, %v4553_v15 }
 0x2a7   : > { %2382 = vmatmul.f32.gmra.mxu2 %v4003_v53  ;;  %2423 = vmatmul.f32.vlgmr.msrb.gmra.mxu3 %v3937_v56  ;;  %v1171_v43 = vadd.f32 %v4956_v39, %v958_v49 }
 0x2a8   : > { %2549 = vmatpush.msrb.mxu3 %v4422_v55  ;;  %2983 = vmatpush.msra.mxu1 %v4545_v1  ;;  %v1472_v52 = vpop.f32.mrf.mxu1  ;;  %v4636_v42 = vpop.f32.mrf.mxu2  ;;  %v943_v55 = vadd.f32 %v4953_v59, %v761_v50  ;;  %v1159_v22 = vadd.f32 %v4955_v7, %v948_v47  ;;  %v1324_v26 = vadd.f32 %v1323_v38, %v1165_v3 }
 0x2a9   : > { %v1842_v8 = vpop.f32.mrf.mxu3 }
 0x2aa   : > { %2551 = vmatpush.msrb.mxu3 %v4434_v33  ;;  %2985 = vmatpush.msra.mxu1 %v4550_v9  ;;  %v2616_v33 = vand.u32 4294901760, %v4427_v51  ;;  %v1153_v31 = vadd.f32 %v4957_v46, %v943_v55  ;;  %v1320_v13 = vadd.f32 %v1319_v61, %v1159_v22 }
 0x2ac   : > { %2553 = vmatpush.msrb.mxu3 %v4448_v36  ;;  %2987 = vmatpush.msra.mxu1 %v4555_v19  ;;  %v1327_v11 = vpop.f32.mrf.mxu0  ;;  %v1473_v36 = vadd.f32 %v1472_v52, %v1324_v26  ;;  %v1316_v38 = vadd.f32 %v4566_v10, %v1153_v31  ;;  %v1469_v61 = vadd.f32 %v1468_v32, %v1320_v13  ;;  %v2634_v52 = vand.u32 4294901760, %v4466_v40 }
 0x2ad   : > { %v1328_v27 = vadd.f32 %v1327_v11, %v1171_v43  ;;  %2859 = vmatmul.f32.gmra.mxu1 %v3963_v45  ;;  %2960 = vmatmul.f32.vlgmr.msra.gmra.mxu0 %v3937_v56  ;;  %v2623_v10 = vsub.f32 %v4439_v14, %v2622_v57  ;;  %v1811_v32 = vadd.f32 %v4610_v0, %v1777_v6 }
 0x2ae   : > { %2555 = vmatpush.msrb.mxu3 %v4460_v24  ;;  %v2617_v24 = vsub.f32 %v4427_v51, %v2616_v33  ;;  %v1465_v47 = vadd.f32 %v4584_v37, %v1316_v38  ;;  %v4663_v54 = vand.u32 4294901760, %v1473_v36  ;;  %v4670_v59 = vand.u32 4294901760, %v1469_v61 }
 0x2af   : > { %2427 = vmatmul.f32.gmra.mxu3 %v3963_v45  ;;  %2457 = vmatmul.f32.vlgmr.msra.gmra.mxu2 %v3950_v18  ;;  %v2629_v37 = vsub.f32 %v4454_v30, %v2628_v60  ;;  %v1843_v14 = vadd.f32 %v1842_v8, %v1811_v32  ;;  %v2624_v29 = vand.u32 4294901760, %v2623_v10  ;;  %v2635_v3 = vsub.f32 %v4466_v40, %v2634_v52 }
 0x2b0   : > { %2578 = vmatpush.msra.mxu2 %v4415_v35  ;;  %v1476_v34 = vpop.f32.mrf.mxu1  ;;  %v1881_v21 = vpop.f32.mrf.mxu2  ;;  %v2618_v15 = vand.u32 4294901760, %v2617_v24  ;;  %v4682_v20 = vand.u32 4294901760, %v1465_v47  ;;  %v4685_v0 = vsub.f32 %v1473_v36, %v4663_v54  ;;  %v4692_v7 = vsub.f32 %v1469_v61, %v4670_v59 }
 0x2b1   : > { %v1477_v50 = vadd.f32 %v1476_v34, %v1328_v27  ;;  %v1848_v28 = vpop.f32.mrf.mxu3  ;;  %v1882_v11 = vadd.f32 %v1881_v21, %v1843_v14  ;;  %v2630_v8 = vand.u32 4294901760, %v2629_v37  ;;  %v1781_v40 = vadd.f32 %v4608_v44, %v4590_v17 }
 0x2b2   : > { %2580 = vmatpush.msra.mxu2 %v4413_v12  ;;  %v4699_v26 = vsub.f32 %v1465_v47, %v4682_v20  ;;  %v2636_v46 = vand.u32 4294901760, %v2635_v3 }
 0x2b3   : > { %v4665_v49 = vand.u32 4294901760, %v1477_v50  ;;  %v1816_v31 = vadd.f32 %v4636_v42, %v1781_v40 }
 0x2b4   : > { %2582 = vmatpush.msra.mxu2 %v4424_v58 }
 0x2b5   : > { %v4673_v55 = vsub.f32 %v1477_v50, %v4665_v49  ;;  %3127 = vmatpush.msrb.mxu1 %v4665_v49  ;;  %2964 = vmatmul.f32.gmra.mxu0 %v3963_v45  ;;  %v1849_v17 = vadd.f32 %v1848_v28, %v1816_v31 }
 0x2b6   : > { %2584 = vmatpush.msra.mxu2 %v4436_v62  ;;  %2989 = vmatmul.f32.vlgmr.msra.gmra.mxu1 %v3937_v56 }
 0x2b7   : > { %2462 = vmatmul.f32.gmra.mxu2 %v3982_v41  ;;  %2489 = vmatmul.f32.vlgmr.msra.gmra.mxu3 %v3960_v48 }
 0x2b8   : > { %2619 = vmatpush.msra.mxu3 %v2618_v15  ;;  %3093 = vmatpush.msrb.mxu0 %v4673_v55  ;;  %v1885_v39 = vpop.f32.mrf.mxu2 }
 0x2b9   : > { %3129 = vmatpush.msrb.mxu1 %v4663_v54  ;;  %v1910_v22 = vpop.f32.mrf.mxu3  ;;  %v1886_v44 = vadd.f32 %v1885_v39, %v1849_v17 }
 0x2ba   : > { %2625 = vmatpush.msra.mxu3 %v2624_v29  ;;  %3096 = vmatpush.msrb.mxu0 %v4685_v0  ;;  %v1911_v43 = vadd.f32 %v1910_v22, %v1882_v11 }
 0x2bb   : > { %3131 = vmatpush.msrb.mxu1 %v4670_v59 }
 0x2bc   : > { %2631 = vmatpush.msra.mxu3 %v2630_v8  ;;  %3099 = vmatpush.msrb.mxu0 %v4692_v7  ;;  %3216 = vst.msk [vmem:[%s4535_s18 + $0x10] sm:$0xff] %vm3213_vm1, %v1911_v43 }
 0x2bd   : > { %3133 = vmatpush.msrb.mxu1 %v4682_v20 }
 0x2be   : > { %2637 = vmatpush.msra.mxu3 %v2636_v46  ;;  %3102 = vmatpush.msrb.mxu0 %v4699_v26 }
 0x2bf   : > { %2495 = vmatmul.f32.gmra.mxu3 %v3991_v63  ;;  %2528 = vmatmul.f32.vlgmr.msrb.gmra.mxu2 %v3937_v56 }
 0x2c0   : > { %2730 = vmatpush.msrb.mxu2 %v2616_v33  ;;  %3105 = vmatmul.f32.vlgmr.msrb.gmra.mxu0 %v3950_v18  ;;  %v1943_v13 = vpop.f32.mrf.mxu2 }
 0x2c1   : > { %v1914_v42 = vpop.f32.mrf.mxu3  ;;  %2993 = vmatmul.f32.gmra.mxu1 %v3963_v45 }
 0x2c2   : > { %2734 = vmatpush.msrb.mxu2 %v2622_v57  ;;  %v1915_v36 = vadd.f32 %v1914_v42, %v1886_v44 }
 0x2c4   : > { %2738 = vmatpush.msrb.mxu2 %v2628_v60  ;;  %3217 = vst.msk [vmem:[%s4535_s18 + $0x18] sm:$0xff] %vm3213_vm1, %v1915_v36 }
 0x2c6   : > { %2742 = vmatpush.msrb.mxu2 %v2634_v52 }
 0x2c7   : > { %2532 = vmatmul.f32.gmra.mxu2 %v3963_v45  ;;  %2557 = vmatmul.f32.vlgmr.msrb.gmra.mxu3 %v3937_v56 }
 0x2c8   : > { %2765 = vmatpush.msrb.mxu3 %v4415_v35  ;;  %3110 = vmatmul.f32.gmra.mxu0 %v3982_v41  ;;  %v1951_v33 = vpop.f32.mrf.mxu2 }
 0x2c9   : > { %v1992_v51 = vpop.f32.mrf.mxu3  ;;  %3137 = vmatmul.f32.vlgmr.msrb.gmra.mxu1 %v3960_v48 }
 0x2ca   : > { %2767 = vmatpush.msrb.mxu3 %v4413_v12 }
 0x2cc   : > { %2769 = vmatpush.msrb.mxu3 %v4424_v58 }
 0x2ce   : > { %2771 = vmatpush.msrb.mxu3 %v4436_v62  ;;  %v3048_v62 = vand.u32 4294901760, %v4673_v55 }
 0x2cf   : > { %2561 = vmatmul.f32.gmra.mxu3 %v3963_v45  ;;  %2590 = vmatmul.f32.vlgmr.msra.gmra.mxu2 %v3987_v23 }
 0x2d0   : > { %2877 = vmatpush.msra.mxu2 %v4571_v5  ;;  %v2026_v30 = vpop.f32.mrf.mxu2  ;;  %v1993_v5 = vadd.f32 %v1992_v51, %v1943_v13 }
 0x2d1   : > { %v1996_v35 = vpop.f32.mrf.mxu3  ;;  %3143 = vmatmul.f32.gmra.mxu1 %v3991_v63 }
 0x2d2   : > { %2880 = vmatpush.msra.mxu2 %v4558_v16  ;;  %v3054_v16 = vand.u32 4294901760, %v4685_v0  ;;  %v2027_v27 = vadd.f32 %v2026_v30, %v1993_v5  ;;  %v1997_v52 = vadd.f32 %v1996_v35, %v1951_v33 }
 0x2d4   : > { %2883 = vmatpush.msra.mxu2 %v4564_v4 }
 0x2d6   : > { %2886 = vmatpush.msra.mxu2 %v4576_v2  ;;  %v3066_v2 = vand.u32 4294901760, %v4699_v26 }
 0x2d7   : > { %2598 = vmatmul.f32.gmra.mxu2 %v4003_v53  ;;  %2639 = vmatmul.f32.vlgmr.msra.gmra.mxu3 %v3937_v56 }
 0x2d8   : > { %2911 = vmatpush.msra.mxu3 %v4560_v25  ;;  %v2031_v58 = vpop.f32.mrf.mxu2  ;;  %v3049_v25 = vsub.f32 %v4673_v55, %v3048_v62  ;;  %v3067_v38 = vsub.f32 %v4699_v26, %v3066_v2 }
 0x2d9   : > { %v2058_v12 = vpop.f32.mrf.mxu3  ;;  %v2032_v10 = vadd.f32 %v2031_v58, %v1997_v52 }
 0x2da   : > { %2913 = vmatpush.msra.mxu3 %v4545_v1  ;;  %v3060_v1 = vand.u32 4294901760, %v4692_v7  ;;  %v3050_v57 = vand.u32 4294901760, %v3049_v25  ;;  %v2059_v60 = vadd.f32 %v2058_v12, %v2027_v27  ;;  %v3068_v47 = vand.u32 4294901760, %v3067_v38 }
 0x2dc   : > { %2915 = vmatpush.msra.mxu3 %v4550_v9  ;;  %v3061_v34 = vsub.f32 %v4692_v7, %v3060_v1 }
 0x2de   : > { %2917 = vmatpush.msra.mxu3 %v4555_v19  ;;  %v3055_v19 = vsub.f32 %v4685_v0, %v3054_v16  ;;  %v3062_v50 = vand.u32 4294901760, %v3061_v34 }
 0x2df   : > { %2643 = vmatmul.f32.gmra.mxu3 %v3963_v45  ;;  %2744 = vmatmul.f32.vlgmr.msrb.gmra.mxu2 %v3937_v56 }
 0x2e0   : > { %3010 = vmatpush.msrb.mxu2 %v4665_v49  ;;  %v2097_v9 = vpop.f32.mrf.mxu2  ;;  %v3056_v24 = vand.u32 4294901760, %v3055_v19 }
 0x2e1   : > { %v2064_v4 = vpop.f32.mrf.mxu3  ;;  %v2098_v61 = vadd.f32 %v2097_v9, %v2059_v60 }
 0x2e2   : > { %3012 = vmatpush.msrb.mxu2 %v4663_v54  ;;  %v2065_v32 = vadd.f32 %v2064_v4, %v2032_v10 }
 0x2e4   : > { %3014 = vmatpush.msrb.mxu2 %v4670_v59 }
 0x2e6   : > { %3016 = vmatpush.msrb.mxu2 %v4682_v20 }
 0x2e7   : > { %2748 = vmatmul.f32.gmra.mxu2 %v3963_v45  ;;  %2773 = vmatmul.f32.vlgmr.msrb.gmra.mxu3 %v3937_v56 }
 0x2e8   : > { %3051 = vmatpush.msrb.mxu3 %v3050_v57  ;;  %v2101_v21 = vpop.f32.mrf.mxu2 }
 0x2e9   : > { %v2126_v28 = vpop.f32.mrf.mxu3  ;;  %v2102_v55 = vadd.f32 %v2101_v21, %v2065_v32 }
 0x2ea   : > { %3057 = vmatpush.msrb.mxu3 %v3056_v24  ;;  %v2127_v6 = vadd.f32 %v2126_v28, %v2098_v61 }
 0x2ec   : > { %3063 = vmatpush.msrb.mxu3 %v3062_v50  ;;  %3218 = vst.msk [vmem:[%s4535_s18 + $0x20] sm:$0xff] %vm3213_vm1, %v2127_v6 }
 0x2ee   : > { %3069 = vmatpush.msrb.mxu3 %v3068_v47 }
 0x2ef   : > { %2777 = vmatmul.f32.gmra.mxu3 %v3963_v45  ;;  %2889 = vmatmul.f32.vlgmr.msra.gmra.mxu2 %v3950_v18 }
 0x2f0   : > { %3162 = vmatpush.msra.mxu2 %v3048_v62  ;;  %v2159_v37 = vpop.f32.mrf.mxu2 }
 0x2f1   : > { %v2130_v15 = vpop.f32.mrf.mxu3 }
 0x2f2   : > { %3166 = vmatpush.msra.mxu2 %v3054_v16  ;;  %v2131_v14 = vadd.f32 %v2130_v15, %v2102_v55 }
 0x2f4   : > { %3170 = vmatpush.msra.mxu2 %v3060_v1  ;;  %3219 = vst.msk [vmem:[%s4535_s18 + $0x28] sm:$0xff] %vm3213_vm1, %v2131_v14 }
 0x2f6   : > { %3174 = vmatpush.msra.mxu2 %v3066_v2 }
 0x2f7   : > { %2921 = vmatmul.f32.vlgmr.msra.gmra.mxu3 %v3960_v48  ;;  %2894 = vmatmul.f32.gmra.mxu2 %v3982_v41 }
 0x2f8   : > { %3197 = vmatpush.msra.mxu3 %v4665_v49  ;;  %v2167_v0 = vpop.f32.mrf.mxu2 }
 0x2f9   : > { %v2208_v18 = vpop.f32.mrf.mxu3 }
 0x2fa   : > { %3199 = vmatpush.msra.mxu3 %v4663_v54 }
 0x2fc   : > { %3201 = vmatpush.msra.mxu3 %v4670_v59  ;;  %v2209_v59 = vadd.f32 %v2208_v18, %v2159_v37  ;;  %v2674_v4 = vpop.f32.mrf.mxu0 }
 0x2fd   : > { %v2706_v5 = vpop.f32.mrf.mxu1 }
 0x2fe   : > { %3203 = vmatpush.msra.mxu3 %v4682_v20 }
 0x2ff   : > { %2927 = vmatmul.f32.gmra.mxu3 %v3991_v63  ;;  %3022 = vmatmul.f32.vlgmr.msrb.gmra.mxu2 %v3987_v23 }
 0x301   : > { %v2212_v29 = vpop.f32.mrf.mxu3  ;;  %v2242_v3 = vpop.f32.mrf.mxu2 }
 0x302   : > { %v2243_v20 = vadd.f32 %v2242_v3, %v2209_v59  ;;  %v2213_v7 = vadd.f32 %v2212_v29, %v2167_v0 }
 0x304   : > { %v2679_v57 = vpop.f32.mrf.mxu0 }
 0x305   : > { %v2712_v24 = vpop.f32.mrf.mxu1 }
 0x307   : > { %3071 = vmatmul.f32.vlgmr.msrb.gmra.mxu3 %v3937_v56  ;;  %3030 = vmatmul.f32.gmra.mxu2 %v4003_v53 }
 0x309   : > { %v2274_v48 = vpop.f32.mrf.mxu3  ;;  %v2247_v41 = vpop.f32.mrf.mxu2 }
 0x30a   : > { %v2275_v63 = vadd.f32 %v2274_v48, %v2243_v20  ;;  %v2248_v22 = vadd.f32 %v2247_v41, %v2213_v7 }
 0x30f   : > { %3075 = vmatmul.f32.gmra.mxu3 %v3963_v45  ;;  %3176 = vmatmul.f32.vlgmr.msra.gmra.mxu2 %v3937_v56 }
 0x311   : > { %v2280_v54 = vpop.f32.mrf.mxu3  ;;  %v2313_v49 = vpop.f32.mrf.mxu2 }
 0x312   : > { %v2314_v23 = vadd.f32 %v2313_v49, %v2275_v63  ;;  %v2281_v39 = vadd.f32 %v2280_v54, %v2248_v22 }
 0x317   : > { %3205 = vmatmul.f32.vlgmr.msra.gmra.mxu3 %v3937_v56  ;;  %3180 = vmatmul.f32.gmra.mxu2 %v3963_v45 }
 0x319   : > { %v2342_v11 = vpop.f32.mrf.mxu3  ;;  %v2317_v53 = vpop.f32.mrf.mxu2 }
 0x31a   : > { %v2343_v8 = vadd.f32 %v2342_v11, %v2314_v23  ;;  %v2318_v40 = vadd.f32 %v2317_v53, %v2281_v39  ;;  %v2807_v21 = vpop.f32.mrf.mxu0 }
 0x31c   : > { %3220 = vst.msk [vmem:[%s4535_s18 + $0x30] sm:$0xff] %vm3213_vm1, %v2343_v8 }
 0x31f   : > { %3209 = vmatmul.f32.gmra.mxu3 %v3963_v45 }
 0x321   : > { %v2346_v43 = vpop.f32.mrf.mxu3 }
 0x322   : > { %v2375_v26 = vpop.f32.mrf.mxu2  ;;  %v2347_v46 = vadd.f32 %v2346_v43, %v2318_v40  ;;  %v2856_v52 = vpop.f32.mrf.mxu1 }
 0x323   : > { %v2815_v14 = vpop.f32.mrf.mxu0  ;;  %v2857_v54 = vadd.f32 %v2856_v52, %v2807_v21 }
 0x324   : > { %3221 = vst.msk [vmem:[%s4535_s18 + $0x38] sm:$0xff] %vm3213_vm1, %v2347_v46 }
 0x32a   : > { %v2424_v56 = vpop.f32.mrf.mxu3  ;;  %v2383_v31 = vpop.f32.mrf.mxu2 }
 0x32b   : > { %v2425_v33 = vadd.f32 %v2424_v56, %v2375_v26  ;;  %v2860_v0 = vpop.f32.mrf.mxu1  ;;  %v2961_v49 = vpop.f32.mrf.mxu0 }
 0x32c   : > { %v2861_v53 = vadd.f32 %v2860_v0, %v2815_v14 }
 0x332   : > { %v2428_v17 = vpop.f32.mrf.mxu3  ;;  %v2458_v44 = vpop.f32.mrf.mxu2 }
 0x333   : > { %v2459_v35 = vadd.f32 %v2458_v44, %v2425_v33  ;;  %v2429_v62 = vadd.f32 %v2428_v17, %v2383_v31  ;;  %v2990_v20 = vpop.f32.mrf.mxu1  ;;  %v2965_v39 = vpop.f32.mrf.mxu0 }
 0x33a   : > { %v2490_v42 = vpop.f32.mrf.mxu3  ;;  %v2463_v13 = vpop.f32.mrf.mxu2 }
 0x33b   : > { %v2491_v30 = vadd.f32 %v2490_v42, %v2459_v35  ;;  %v2464_v25 = vadd.f32 %v2463_v13, %v2429_v62 }
 0x33d   : > { %v3106_v42 = vpop.f32.mrf.mxu0 }
 0x33e   : > { %v2994_v46 = vpop.f32.mrf.mxu1 }
 0x342   : > { %v2496_v36 = vpop.f32.mrf.mxu3  ;;  %v2529_v51 = vpop.f32.mrf.mxu2 }
 0x343   : > { %v2530_v45 = vadd.f32 %v2529_v51, %v2491_v30  ;;  %v2497_v1 = vadd.f32 %v2496_v36, %v2464_v25 }
 0x346   : > { %v3138_v51 = vpop.f32.mrf.mxu1 }
 0x34a   : > { %v2558_v12 = vpop.f32.mrf.mxu3  ;;  %v2533_v58 = vpop.f32.mrf.mxu2 }
 0x34b   : > { %v2559_v16 = vadd.f32 %v2558_v12, %v2530_v45  ;;  %v2534_v9 = vadd.f32 %v2533_v58, %v2497_v1  ;;  %v3111_v12 = vpop.f32.mrf.mxu0 }
 0x34d   : > { %3222 = vst.msk [vmem:[%s4535_s18 + $0x40] sm:$0xff] %vm3213_vm1, %v2559_v16 }
 0x34e   : > { %v3144_v1 = vpop.f32.mrf.mxu1 }
 0x352   : > { %v2562_v19 = vpop.f32.mrf.mxu3  ;;  %v2591_v2 = vpop.f32.mrf.mxu2 }
 0x353   : > { %v2563_v27 = vadd.f32 %v2562_v19, %v2534_v9 }
 0x355   : > { %3223 = vst.msk [vmem:[%s4535_s18 + $0x48] sm:$0xff] %vm3213_vm1, %v2563_v27 }
 0x35a   : > { %v2640_v34 = vpop.f32.mrf.mxu3  ;;  %v2599_v60 = vpop.f32.mrf.mxu2 }
 0x35b   : > { %v2641_v38 = vadd.f32 %v2640_v34, %v2591_v2 }
 0x35d   : > { %v2675_v28 = vadd.f32 %v2674_v4, %v2641_v38 }
 0x35f   : > { %v2707_v47 = vadd.f32 %v2706_v5, %v2675_v28 }
 0x362   : > { %v2644_v61 = vpop.f32.mrf.mxu3  ;;  %v2745_v50 = vpop.f32.mrf.mxu2 }
 0x363   : > { %v2645_v6 = vadd.f32 %v2644_v61, %v2599_v60  ;;  %v2746_v10 = vadd.f32 %v2745_v50, %v2707_v47 }
 0x365   : > { %v2680_v37 = vadd.f32 %v2679_v57, %v2645_v6 }
 0x367   : > { %v2713_v18 = vadd.f32 %v2712_v24, %v2680_v37 }
 0x36a   : > { %v2774_v32 = vpop.f32.mrf.mxu3  ;;  %v2749_v55 = vpop.f32.mrf.mxu2 }
 0x36b   : > { %v2775_v15 = vadd.f32 %v2774_v32, %v2746_v10  ;;  %v2750_v29 = vadd.f32 %v2749_v55, %v2713_v18 }
 0x36d   : > { %3224 = vst.msk [vmem:[%s4535_s18 + $0x50] sm:$0xff] %vm3213_vm1, %v2775_v15 }
 0x372   : > { %v2778_v3 = vpop.f32.mrf.mxu3  ;;  %v2890_v48 = vpop.f32.mrf.mxu2 }
 0x373   : > { %v2779_v41 = vadd.f32 %v2778_v3, %v2750_v29  ;;  %v2891_v59 = vadd.f32 %v2890_v48, %v2857_v54 }
 0x375   : > { %3225 = vst.msk [vmem:[%s4535_s18 + $0x58] sm:$0xff] %vm3213_vm1, %v2779_v41 }
 0x37a   : > { %v2922_v63 = vpop.f32.mrf.mxu3  ;;  %v2895_v23 = vpop.f32.mrf.mxu2 }
 0x37b   : > { %v2923_v11 = vadd.f32 %v2922_v63, %v2891_v59  ;;  %v2896_v22 = vadd.f32 %v2895_v23, %v2861_v53 }
 0x37d   : > { %v2962_v7 = vadd.f32 %v2961_v49, %v2923_v11 }
 0x37f   : > { %v2991_v8 = vadd.f32 %v2990_v20, %v2962_v7 }
 0x381   : > { %3226 = vst.msk [vmem:[%s4535_s18 + $0x60] sm:$0xff] %vm3213_vm1, %v2991_v8 }
 0x382   : > { %v2928_v40 = vpop.f32.mrf.mxu3  ;;  %v3023_v43 = vpop.f32.mrf.mxu2 }
 0x383   : > { %v2929_v26 = vadd.f32 %v2928_v40, %v2896_v22 }
 0x385   : > { %v2966_v56 = vadd.f32 %v2965_v39, %v2929_v26 }
 0x387   : > { %v2995_v31 = vadd.f32 %v2994_v46, %v2966_v56 }
 0x389   : > { %3227 = vst.msk [vmem:[%s4535_s18 + $0x68] sm:$0xff] %vm3213_vm1, %v2995_v31 }
 0x38a   : > { %v3072_v17 = vpop.f32.mrf.mxu3  ;;  %v3031_v44 = vpop.f32.mrf.mxu2 }
 0x38b   : > { %v3073_v13 = vadd.f32 %v3072_v17, %v3023_v43 }
 0x38d   : > { %v3107_v33 = vadd.f32 %v3106_v42, %v3073_v13 }
 0x38f   : > { %v3139_v45 = vadd.f32 %v3138_v51, %v3107_v33 }
 0x392   : > { %v3076_v36 = vpop.f32.mrf.mxu3  ;;  %v3177_v35 = vpop.f32.mrf.mxu2 }
 0x393   : > { %v3077_v30 = vadd.f32 %v3076_v36, %v3031_v44  ;;  %v3178_v58 = vadd.f32 %v3177_v35, %v3139_v45 }
 0x395   : > { %v3112_v25 = vadd.f32 %v3111_v12, %v3077_v30 }
 0x397   : > { %v3145_v9 = vadd.f32 %v3144_v1, %v3112_v25 }
 0x39a   : > { %v3206_v62 = vpop.f32.mrf.mxu3  ;;  %v3181_v4 = vpop.f32.mrf.mxu2 }
 0x39b   : > { %v3207_v16 = vadd.f32 %v3206_v62, %v3178_v58  ;;  %v3182_v5 = vadd.f32 %v3181_v4, %v3145_v9 }
 0x39d   : > { %3228 = vst.msk [vmem:[%s4535_s18 + $0x70] sm:$0xff] %vm3213_vm1, %v3207_v16 }
 0x3a2   : > { %v3210_v19 = vpop.f32.mrf.mxu3 }
 0x3a3   : > { %v3211_v2 = vadd.f32 %v3210_v19, %v3182_v5 }
 0x3a5   : > { %3229 = vst.msk [vmem:[%s4535_s18 + $0x78] sm:$0xff] %vm3213_vm1, %v3211_v2 }
 0x3a6 PF: > { %p13_p7 = scmp.ge.s32.totalorder %s3466_s17, 6   ;;  %s4958_s12 = smov %s3414_s13 }
 0x3a7   : > { %s4959_s13 = smov %s3418_s14  ;;  %s4960_s14 = smov %s3476_s20 }
 0x3a8   : > { %s4961_s15 = smov %s3466_s17  ;;  %15 = sbr.rel (!%p13_p7) target bundleno = 3 (0x3), region = 72 }
 0x3ad   :  { %3254 = vsyncpa [#allocation3], 1 }
 0x3ae   :  { %3256 = vsyncpa [#allocation3 + $0x1], 1 }

</bundles_post_ra>
